<compile_context>
chip_gen: v5e
topology: v5e:2x2
jax: 0.10.0
libtpu: 0.0.40
codegen_flags: <defaults>
</compile_context>

<pallas_src>
import math

import jax
import jax.numpy as jnp
import numpy as np
from jax.experimental import pallas as pl
from jax.experimental.pallas import tpu as pltpu


# ----------------------------------------------------------------------------
# helpers
# ----------------------------------------------------------------------------
def _pad128(n):
    """Pad a channel count up to a multiple of 128 (lane width)."""
    return ((n + 127) // 128) * 128


def _batch_tile(B, L, c_pad_max):
    """Sequences per grid step: enough rows to amortize per-step overhead while
    keeping the fp32 activation slab within a few MiB of VMEM (v7x-safe)."""
    vmem_rows = max(L, (4 << 20) // (4 * max(c_pad_max, 1)))
    want_rows = min(B * L, max(256, L), vmem_rows)
    tb = max(1, want_rows // L)
    step = 8 // math.gcd(L, 8)          # smallest tb such that (tb * L) % 8 == 0
    tb = max(step, (tb // step) * step)
    return B if tb >= B else tb


# ----------------------------------------------------------------------------
# fused TCN kernel
# ----------------------------------------------------------------------------
def _make_tcn_kernel(L, R, blocks):
    """Kernel closure.  Ref order (all 2-D, channels zero-padded to x128):
       x_ref : (R, Cin_pad)                        R = sequences_per_step * L
       per TemporalBlock: w1 (K*Cin_p, Cout_p), b1 (1, Cout_p),
                          w2 (K*Cout_p, Cout_p), b2 (1, Cout_p),
                          [wd (Cin_p, Cout_p), bd (1, Cout_p)]   if downsample
       final linear: wl (Clast_p, Out_p), bl (1, Out_p)
       o_ref : (R, Out_p)
    """

    def kernel(*refs):
        refs = list(refs)
        x_ref = refs.pop(0)
        o_ref = refs.pop()

        # Row index within its own length-L sequence.  Grid blocks always start
        # on a sequence boundary, so a plain row-iota mod L is exact.
        t_in_seq = jax.lax.broadcasted_iota(jnp.int32, (R, 1), 0) % L

        def shifted(h, s):
            """h[t - s, :] with zeros where t_in_seq < s (causal left padding).
            roll uses the otherwise-idle XLU; the mask is a cheap VPU select."""
            if s == 0:
                return h
            if s >= L:                 # receptive field falls entirely in the pad
                return jnp.zeros_like(h)
            rolled = pltpu.roll(h, shift=s, axis=0)
            return jnp.where(t_in_seq < s, 0.0, rolled)

        def causal_conv(h, w_ref, b_ref, K, dilation):
            """Causal dilated conv as ONE im2col matmul:
               slab (R, K*C) @ W (K*C, Cout) — a single MXU stream with a
               K*C-wide contraction instead of K tiny dots."""
            taps = [shifted(h, (K - 1 - j) * dilation) for j in range(K)]
            slab = taps[0] if K == 1 else jnp.concatenate(taps, axis=1)
            w = w_ref[...]                         # keep weights in storage dtype
            acc = jnp.dot(slab.astype(w.dtype), w,
                          preferred_element_type=jnp.float32)
            return acc + b_ref[...].astype(jnp.float32)   # bias once per conv

        h = x_ref[...]
        for blk in blocks:
            K, dil = blk["K"], blk["dilation"]
            w1, b1 = refs.pop(0), refs.pop(0)
            w2, b2 = refs.pop(0), refs.pop(0)
            x_in = h
            h1 = jnp.maximum(causal_conv(x_in, w1, b1, K, dil), 0.0)  # conv1+chomp+relu
            # dropout1 / dropout2: identity (eval-mode semantics)
            h2 = jnp.maximum(causal_conv(h1, w2, b2, K, dil), 0.0)    # conv2+chomp+relu
            if blk["has_down"]:
                wd, bd = refs.pop(0), refs.pop(0)
                w = wd[...]
                res = jnp.dot(x_in.astype(w.dtype), w,
                              preferred_element_type=jnp.float32)
                res = res + bd[...].astype(jnp.float32)
            else:
                res = x_in
            h = jnp.maximum(h2 + res, 0.0)                            # residual + relu

        # Final per-timestep Linear + sigmoid (lane-dense Out_pad output).
        wl, bl = refs.pop(0), refs.pop(0)
        w = wl[...]
        logits = jnp.dot(h.astype(w.dtype), w, preferred_element_type=jnp.float32)
        logits = logits + bl[...].astype(jnp.float32)
        o_ref[...] = (1.0 / (1.0 + jnp.exp(-logits))).astype(o_ref.dtype)

    return kernel


# ----------------------------------------------------------------------------
# wrapper: full TCN.forward in a single pallas_call
# ----------------------------------------------------------------------------
def tcn_forward_pallas(x_nlc, params, lin_w, lin_b, K):
    """x_nlc: (B, L, C_in) — the user-facing layout of TCN.forward (it transposes
    dims 1 and -1 before the Conv1d stack).  Returns (B, L, output_size)."""
    B, L, Cin = x_nlc.shape
    out_size = lin_w.shape[0]

    chans = [Cin] + [p["w1"].shape[0] for p in params]
    chans_pad = [_pad128(c) for c in chans]
    out_pad = _pad128(out_size)

    def conv_mat(w, cin_p, cout_p):        # (Cout, Cin, K) -> (K*Cin_p, Cout_p)
        co, ci, kw = w.shape
        wt = jnp.transpose(w, (2, 1, 0))   # tap j pairs with shift (K-1-j)*dilation
        wt = jnp.pad(wt, ((0, 0), (0, cin_p - ci), (0, cout_p - co)))
        return wt.reshape(kw * cin_p, cout_p)

    def row_vec(b, cout_p):                # (Cout,) -> (1, Cout_p)
        return jnp.pad(b, (0, cout_p - b.shape[0])).reshape(1, cout_p)

    tb = _batch_tile(B, L, max(chans_pad + [out_pad]))
    R = tb * L
    grid = (pl.cdiv(B, tb),)

    args, in_specs, blocks = [], [], []

    # input slab: batch folded into the sublane/row axis, channels lane-padded
    x2d = jnp.pad(x_nlc, ((0, 0), (0, 0), (0, chans_pad[0] - Cin)))
    x2d = x2d.reshape(B * L, chans_pad[0])
    args.append(x2d)
    in_specs.append(pl.BlockSpec((R, chans_pad[0]), lambda i: (i, 0)))

    for li, p in enumerate(params):
        cin_p, cout_p = chans_pad[li], chans_pad[li + 1]
        has_down = p["wd"] is not None
        blocks.append(dict(K=K, dilation=p["dilation"], has_down=has_down))
        layer_args = [conv_mat(p["w1"], cin_p, cout_p), row_vec(p["b1"], cout_p),
                      conv_mat(p["w2"], cout_p, cout_p), row_vec(p["b2"], cout_p)]
        if has_down:
            wd = p["wd"][:, :, 0]          # (Cout, Cin)
            wdm = jnp.pad(wd.T, ((0, cin_p - wd.shape[1]), (0, cout_p - wd.shape[0])))
            layer_args += [wdm, row_vec(p["bd"], cout_p)]
        for a in layer_args:
            args.append(a)
            in_specs.append(pl.BlockSpec(a.shape, lambda i: (0, 0)))  # VMEM-resident

    # final linear weights
    c_last_p = chans_pad[-1]
    wlm = jnp.pad(lin_w.T, ((0, c_last_p - lin_w.shape[1]), (0, out_pad - out_size)))
    for a in (wlm, row_vec(lin_b, out_pad)):
        args.append(a)
        in_specs.append(pl.BlockSpec(a.shape, lambda i: (0, 0)))

    out2d = pl.pallas_call(
        _make_tcn_kernel(L, R, blocks),
        out_shape=jax.ShapeDtypeStruct((B * L, out_pad), x_nlc.dtype),
        grid=grid,
        in_specs=in_specs,
        out_specs=pl.BlockSpec((R, out_pad), lambda i: (i, 0)),
        compiler_params=pltpu.CompilerParams(
            dimension_semantics=("parallel",),     # batch tiles are independent
            vmem_limit_bytes=32 * 1024 * 1024,     # explicit; safe on v7x (64 MiB)
        ),
    )(*args)

    # TODO(synk): very long sequences would additionally need an L-tiling grid
    # axis with a (K-1)*dilation halo per layer to fit v7x's smaller VMEM.
    return out2d.reshape(B, L, out_pad)[:, :, :out_size]


# ----------------------------------------------------------------------------
# pure-JAX reference (lax.conv_general_dilated) for the correctness check
# ----------------------------------------------------------------------------
def tcn_forward_ref(x_nlc, params, lin_w, lin_b, K):
    h = jnp.transpose(x_nlc, (0, 2, 1))            # (B, C, L)
    for p in params:
        dilation = p["dilation"]
        pad = (K - 1) * dilation

        def conv(z, w, b):
            y = jax.lax.conv_general_dilated(
                z, w, window_strides=(1,), padding=[(pad, pad)],
                rhs_dilation=(dilation,), dimension_numbers=("NCH", "OIH", "NCH"))
            y = y[:, :, : y.shape[2] - pad]        # Chomp1d
            return y + b[None, :, None]

        h1 = jax.nn.relu(conv(h, p["w1"], p["b1"]))
        h2 = jax.nn.relu(conv(h1, p["w2"], p["b2"]))
        if p["wd"] is None:
            res = h
        else:
            res = jnp.einsum("oc,bcl->bol", p["wd"][:, :, 0], h) + p["bd"][None, :, None]
        h = jax.nn.relu(h2 + res)
    y1 = jnp.transpose(h, (0, 2, 1))               # (B, L, C_last)
    return jax.nn.sigmoid(y1 @ lin_w.T + lin_b)


# ----------------------------------------------------------------------------
# deterministic parameters (weight_norm baked in: w = g * v / ||v||, dim=0)
# ----------------------------------------------------------------------------
def make_params(key, num_inputs, num_channels, K, output_size):
    params = []
    in_ch = num_inputs
    for i, out_ch in enumerate(num_channels):
        dilation = 2 ** i
        key, k1, k2, k3, k4, k5, k6, k7, k8 = jax.random.split(key, 9)

        def wn_weight(kv, kg, co, ci):
            v = 0.01 * jax.random.normal(kv, (co, ci, K), jnp.float32)
            g = jax.random.uniform(kg, (co,), jnp.float32, 0.5, 1.5)
            nrm = jnp.sqrt(jnp.sum(v * v, axis=(1, 2), keepdims=True))
            return g[:, None, None] * v / nrm

        w1 = wn_weight(k1, k2, out_ch, in_ch)
        b1 = 0.1 * jax.random.normal(k3, (out_ch,), jnp.float32)
        w2 = wn_weight(k4, k5, out_ch, out_ch)
        b2 = 0.1 * jax.random.normal(k6, (out_ch,), jnp.float32)
        if in_ch != out_ch:
            wd = 0.01 * jax.random.normal(k7, (out_ch, in_ch, 1), jnp.float32)
            bd = 0.1 * jax.random.normal(k8, (out_ch,), jnp.float32)
        else:
            wd, bd = None, None
        params.append(dict(w1=w1, b1=b1, w2=w2, b2=b2, wd=wd, bd=bd, dilation=dilation))
        in_ch = out_ch

    key, kw, kb = jax.random.split(key, 3)
    lin_w = 0.1 * jax.random.normal(kw, (output_size, num_channels[-1]), jnp.float32)
    lin_b = 0.1 * jax.random.normal(kb, (output_size,), jnp.float32)
    return params, lin_w, lin_b, key


if __name__ == "__main__":
    B, L = 2, 16
    input_size = 4
    num_channels = [8, 16, 16]       # last block exercises the no-downsample path
    kernel_size = 2
    output_size = 6

    key = jax.random.PRNGKey(0)
    params, lin_w, lin_b, key = make_params(key, input_size, num_channels,
                                            kernel_size, output_size)
    key, kx = jax.random.split(key)
    x = jax.random.normal(kx, (B, L, input_size), jnp.float32)   # (N, L, C_in)

    y = tcn_forward_pallas(x, params, lin_w, lin_b, kernel_size)
    y = jax.block_until_ready(y)

    y_ref = tcn_forward_ref(x, params, lin_w, lin_b, kernel_size)
    assert y.shape == (B, L, output_size), y.shape
    np.testing.assert_allclose(np.asarray(y), np.asarray(y_ref), rtol=1e-5, atol=1e-5)
    print("KERNEL_OK")
</pallas_src>

<mosaic_0001>
module attributes {stable_mosaic.version = 11 : i64} {
  func.func @kernel(%arg0: i32, %arg1: memref<32x128xf32, #tpu.memory_space<vmem>>, %arg2: memref<256x128xf32, #tpu.memory_space<vmem>>, %arg3: memref<1x128xf32, #tpu.memory_space<vmem>>, %arg4: memref<256x128xf32, #tpu.memory_space<vmem>>, %arg5: memref<1x128xf32, #tpu.memory_space<vmem>>, %arg6: memref<128x128xf32, #tpu.memory_space<vmem>>, %arg7: memref<1x128xf32, #tpu.memory_space<vmem>>, %arg8: memref<256x128xf32, #tpu.memory_space<vmem>>, %arg9: memref<1x128xf32, #tpu.memory_space<vmem>>, %arg10: memref<256x128xf32, #tpu.memory_space<vmem>>, %arg11: memref<1x128xf32, #tpu.memory_space<vmem>>, %arg12: memref<128x128xf32, #tpu.memory_space<vmem>>, %arg13: memref<1x128xf32, #tpu.memory_space<vmem>>, %arg14: memref<256x128xf32, #tpu.memory_space<vmem>>, %arg15: memref<1x128xf32, #tpu.memory_space<vmem>>, %arg16: memref<256x128xf32, #tpu.memory_space<vmem>>, %arg17: memref<1x128xf32, #tpu.memory_space<vmem>>, %arg18: memref<128x128xf32, #tpu.memory_space<vmem>>, %arg19: memref<1x128xf32, #tpu.memory_space<vmem>>, %arg20: memref<32x128xf32, #tpu.memory_space<vmem>>) attributes {dimension_semantics = [#tpu.dimension_semantics<parallel>], iteration_bounds = array<i64: 1>, scalar_prefetch = 0 : i64, scratch_operands = 0 : i64, tpu.core_type = #tpu.core_type<tc>, window_params = [{transform_indices = @transform_0, window_bounds = array<i64: 32, 128>}, {pipeline_mode = #tpu.pipeline_mode<synchronous>, transform_indices = @transform_1, window_bounds = array<i64: 256, 128>}, {pipeline_mode = #tpu.pipeline_mode<synchronous>, transform_indices = @transform_2, window_bounds = array<i64: 1, 128>}, {pipeline_mode = #tpu.pipeline_mode<synchronous>, transform_indices = @transform_3, window_bounds = array<i64: 256, 128>}, {pipeline_mode = #tpu.pipeline_mode<synchronous>, transform_indices = @transform_4, window_bounds = array<i64: 1, 128>}, {pipeline_mode = #tpu.pipeline_mode<synchronous>, transform_indices = @transform_5, window_bounds = array<i64: 128, 128>}, {pipeline_mode = #tpu.pipeline_mode<synchronous>, transform_indices = @transform_6, window_bounds = array<i64: 1, 128>}, {pipeline_mode = #tpu.pipeline_mode<synchronous>, transform_indices = @transform_7, window_bounds = array<i64: 256, 128>}, {pipeline_mode = #tpu.pipeline_mode<synchronous>, transform_indices = @transform_8, window_bounds = array<i64: 1, 128>}, {pipeline_mode = #tpu.pipeline_mode<synchronous>, transform_indices = @transform_9, window_bounds = array<i64: 256, 128>}, {pipeline_mode = #tpu.pipeline_mode<synchronous>, transform_indices = @transform_10, window_bounds = array<i64: 1, 128>}, {pipeline_mode = #tpu.pipeline_mode<synchronous>, transform_indices = @transform_11, window_bounds = array<i64: 128, 128>}, {pipeline_mode = #tpu.pipeline_mode<synchronous>, transform_indices = @transform_12, window_bounds = array<i64: 1, 128>}, {pipeline_mode = #tpu.pipeline_mode<synchronous>, transform_indices = @transform_13, window_bounds = array<i64: 256, 128>}, {pipeline_mode = #tpu.pipeline_mode<synchronous>, transform_indices = @transform_14, window_bounds = array<i64: 1, 128>}, {pipeline_mode = #tpu.pipeline_mode<synchronous>, transform_indices = @transform_15, window_bounds = array<i64: 256, 128>}, {pipeline_mode = #tpu.pipeline_mode<synchronous>, transform_indices = @transform_16, window_bounds = array<i64: 1, 128>}, {pipeline_mode = #tpu.pipeline_mode<synchronous>, transform_indices = @transform_17, window_bounds = array<i64: 128, 128>}, {pipeline_mode = #tpu.pipeline_mode<synchronous>, transform_indices = @transform_18, window_bounds = array<i64: 1, 128>}, {transform_indices = @transform_19, window_bounds = array<i64: 32, 128>}]} {
    %0 = tpu.iota {dimensions = array<i32: 0>} : vector<32x1xi32>
    %c16_i32 = arith.constant 16 : i32
    %c0_i32 = arith.constant 0 : i32
    %1 = arith.cmpi eq, %c16_i32, %c0_i32 : i32
    %c1_i32 = arith.constant 1 : i32
    %2 = arith.select %1, %c1_i32, %c16_i32 : i32
    %3 = vector.broadcast %2 : i32 to vector<32x1xi32>
    %4 = arith.remsi %0, %3 : vector<32x1xi32>
    %c0_i32_0 = arith.constant 0 : i32
    %5 = vector.broadcast %c0_i32_0 : i32 to vector<32x1xi32>
    %6 = arith.cmpi ne, %4, %5 : vector<32x1xi32>
    %c0_i32_1 = arith.constant 0 : i32
    %7 = vector.broadcast %c0_i32_1 : i32 to vector<32x1xi32>
    %8 = arith.cmpi slt, %4, %7 : vector<32x1xi32>
    %c0_i32_2 = arith.constant 0 : i32
    %9 = arith.cmpi slt, %2, %c0_i32_2 : i32
    %10 = vector.broadcast %9 : i1 to vector<32x1xi1>
    %11 = vector.broadcast %10 : vector<32x1xi1> to vector<32x1xi1>
    %12 = arith.xori %8, %11 : vector<32x1xi1>
    %13 = arith.andi %12, %6 : vector<32x1xi1>
    %14 = vector.broadcast %2 : i32 to vector<32x1xi32>
    %15 = arith.addi %4, %14 : vector<32x1xi32>
    %16 = arith.select %13, %15, %4 : vector<32x1xi1>, vector<32x1xi32>
    %c0 = arith.constant 0 : index
    %c0_3 = arith.constant 0 : index
    %17 = vector.load %arg1[%c0, %c0_3] : memref<32x128xf32, #tpu.memory_space<vmem>>, vector<32x128xf32>
    %c1_i32_4 = arith.constant 1 : i32
    %18 = tpu.dynamic_rotate %17 by %c1_i32_4 dim 0 : vector<32x128xf32>, i32 -> vector<32x128xf32>
    %c1_i32_5 = arith.constant 1 : i32
    %19 = vector.broadcast %c1_i32_5 : i32 to vector<32x1xi32>
    %20 = arith.cmpi slt, %16, %19 : vector<32x1xi32>
    %cst = arith.constant 0.000000e+00 : f32
    %21 = vector.shape_cast %20 : vector<32x1xi1> to vector<32x1xi1>
    %22 = vector.broadcast %21 : vector<32x1xi1> to vector<32x128xi1>
    %23 = vector.broadcast %cst : f32 to vector<32x128xf32>
    %24 = arith.select %22, %23, %18 : vector<32x128xi1>, vector<32x128xf32>
    %25 = tpu.concatenate %24, %17 in 1 : vector<32x128xf32>, vector<32x128xf32> -> vector<32x256xf32>
    %c0_6 = arith.constant 0 : index
    %c0_7 = arith.constant 0 : index
    %26 = vector.load %arg2[%c0_6, %c0_7] : memref<256x128xf32, #tpu.memory_space<vmem>>, vector<256x128xf32>
    %cst_8 = arith.constant dense<0.000000e+00> : vector<32x128xf32>
    %27 = tpu.matmul %25, %26, %cst_8 {dimension_numbers = #tpu.dot_dimension_numbers<[1], [0], [0], [1], [0, 0, 1, 1], [], []>} : vector<32x256xf32>, vector<256x128xf32>, vector<32x128xf32> -> vector<32x128xf32>
    %c0_9 = arith.constant 0 : index
    %c0_10 = arith.constant 0 : index
    %28 = vector.load %arg3[%c0_9, %c0_10] : memref<1x128xf32, #tpu.memory_space<vmem>>, vector<1x128xf32>
    %29 = vector.broadcast %28 : vector<1x128xf32> to vector<32x128xf32>
    %30 = arith.addf %27, %29 : vector<32x128xf32>
    %cst_11 = arith.constant 0.000000e+00 : f32
    %31 = vector.broadcast %cst_11 : f32 to vector<32x128xf32>
    %32 = arith.maximumf %30, %31 : vector<32x128xf32>
    %c1_i32_12 = arith.constant 1 : i32
    %33 = tpu.dynamic_rotate %32 by %c1_i32_12 dim 0 : vector<32x128xf32>, i32 -> vector<32x128xf32>
    %c1_i32_13 = arith.constant 1 : i32
    %34 = vector.broadcast %c1_i32_13 : i32 to vector<32x1xi32>
    %35 = arith.cmpi slt, %16, %34 : vector<32x1xi32>
    %cst_14 = arith.constant 0.000000e+00 : f32
    %36 = vector.shape_cast %35 : vector<32x1xi1> to vector<32x1xi1>
    %37 = vector.broadcast %36 : vector<32x1xi1> to vector<32x128xi1>
    %38 = vector.broadcast %cst_14 : f32 to vector<32x128xf32>
    %39 = arith.select %37, %38, %33 : vector<32x128xi1>, vector<32x128xf32>
    %40 = tpu.concatenate %39, %32 in 1 : vector<32x128xf32>, vector<32x128xf32> -> vector<32x256xf32>
    %c0_15 = arith.constant 0 : index
    %c0_16 = arith.constant 0 : index
    %41 = vector.load %arg4[%c0_15, %c0_16] : memref<256x128xf32, #tpu.memory_space<vmem>>, vector<256x128xf32>
    %cst_17 = arith.constant dense<0.000000e+00> : vector<32x128xf32>
    %42 = tpu.matmul %40, %41, %cst_17 {dimension_numbers = #tpu.dot_dimension_numbers<[1], [0], [0], [1], [0, 0, 1, 1], [], []>} : vector<32x256xf32>, vector<256x128xf32>, vector<32x128xf32> -> vector<32x128xf32>
    %c0_18 = arith.constant 0 : index
    %c0_19 = arith.constant 0 : index
    %43 = vector.load %arg5[%c0_18, %c0_19] : memref<1x128xf32, #tpu.memory_space<vmem>>, vector<1x128xf32>
    %44 = vector.broadcast %43 : vector<1x128xf32> to vector<32x128xf32>
    %45 = arith.addf %42, %44 : vector<32x128xf32>
    %cst_20 = arith.constant 0.000000e+00 : f32
    %46 = vector.broadcast %cst_20 : f32 to vector<32x128xf32>
    %47 = arith.maximumf %45, %46 : vector<32x128xf32>
    %c0_21 = arith.constant 0 : index
    %c0_22 = arith.constant 0 : index
    %48 = vector.load %arg6[%c0_21, %c0_22] : memref<128x128xf32, #tpu.memory_space<vmem>>, vector<128x128xf32>
    %cst_23 = arith.constant dense<0.000000e+00> : vector<32x128xf32>
    %49 = tpu.matmul %17, %48, %cst_23 {dimension_numbers = #tpu.dot_dimension_numbers<[1], [0], [0], [1], [0, 0, 1, 1], [], []>} : vector<32x128xf32>, vector<128x128xf32>, vector<32x128xf32> -> vector<32x128xf32>
    %c0_24 = arith.constant 0 : index
    %c0_25 = arith.constant 0 : index
    %50 = vector.load %arg7[%c0_24, %c0_25] : memref<1x128xf32, #tpu.memory_space<vmem>>, vector<1x128xf32>
    %51 = vector.broadcast %50 : vector<1x128xf32> to vector<32x128xf32>
    %52 = arith.addf %49, %51 : vector<32x128xf32>
    %53 = arith.addf %47, %52 : vector<32x128xf32>
    %cst_26 = arith.constant 0.000000e+00 : f32
    %54 = vector.broadcast %cst_26 : f32 to vector<32x128xf32>
    %55 = arith.maximumf %53, %54 : vector<32x128xf32>
    %c2_i32 = arith.constant 2 : i32
    %56 = tpu.dynamic_rotate %55 by %c2_i32 dim 0 : vector<32x128xf32>, i32 -> vector<32x128xf32>
    %c2_i32_27 = arith.constant 2 : i32
    %57 = vector.broadcast %c2_i32_27 : i32 to vector<32x1xi32>
    %58 = arith.cmpi slt, %16, %57 : vector<32x1xi32>
    %cst_28 = arith.constant 0.000000e+00 : f32
    %59 = vector.shape_cast %58 : vector<32x1xi1> to vector<32x1xi1>
    %60 = vector.broadcast %59 : vector<32x1xi1> to vector<32x128xi1>
    %61 = vector.broadcast %cst_28 : f32 to vector<32x128xf32>
    %62 = arith.select %60, %61, %56 : vector<32x128xi1>, vector<32x128xf32>
    %63 = tpu.concatenate %62, %55 in 1 : vector<32x128xf32>, vector<32x128xf32> -> vector<32x256xf32>
    %c0_29 = arith.constant 0 : index
    %c0_30 = arith.constant 0 : index
    %64 = vector.load %arg8[%c0_29, %c0_30] : memref<256x128xf32, #tpu.memory_space<vmem>>, vector<256x128xf32>
    %cst_31 = arith.constant dense<0.000000e+00> : vector<32x128xf32>
    %65 = tpu.matmul %63, %64, %cst_31 {dimension_numbers = #tpu.dot_dimension_numbers<[1], [0], [0], [1], [0, 0, 1, 1], [], []>} : vector<32x256xf32>, vector<256x128xf32>, vector<32x128xf32> -> vector<32x128xf32>
    %c0_32 = arith.constant 0 : index
    %c0_33 = arith.constant 0 : index
    %66 = vector.load %arg9[%c0_32, %c0_33] : memref<1x128xf32, #tpu.memory_space<vmem>>, vector<1x128xf32>
    %67 = vector.broadcast %66 : vector<1x128xf32> to vector<32x128xf32>
    %68 = arith.addf %65, %67 : vector<32x128xf32>
    %cst_34 = arith.constant 0.000000e+00 : f32
    %69 = vector.broadcast %cst_34 : f32 to vector<32x128xf32>
    %70 = arith.maximumf %68, %69 : vector<32x128xf32>
    %c2_i32_35 = arith.constant 2 : i32
    %71 = tpu.dynamic_rotate %70 by %c2_i32_35 dim 0 : vector<32x128xf32>, i32 -> vector<32x128xf32>
    %c2_i32_36 = arith.constant 2 : i32
    %72 = vector.broadcast %c2_i32_36 : i32 to vector<32x1xi32>
    %73 = arith.cmpi slt, %16, %72 : vector<32x1xi32>
    %cst_37 = arith.constant 0.000000e+00 : f32
    %74 = vector.shape_cast %73 : vector<32x1xi1> to vector<32x1xi1>
    %75 = vector.broadcast %74 : vector<32x1xi1> to vector<32x128xi1>
    %76 = vector.broadcast %cst_37 : f32 to vector<32x128xf32>
    %77 = arith.select %75, %76, %71 : vector<32x128xi1>, vector<32x128xf32>
    %78 = tpu.concatenate %77, %70 in 1 : vector<32x128xf32>, vector<32x128xf32> -> vector<32x256xf32>
    %c0_38 = arith.constant 0 : index
    %c0_39 = arith.constant 0 : index
    %79 = vector.load %arg10[%c0_38, %c0_39] : memref<256x128xf32, #tpu.memory_space<vmem>>, vector<256x128xf32>
    %cst_40 = arith.constant dense<0.000000e+00> : vector<32x128xf32>
    %80 = tpu.matmul %78, %79, %cst_40 {dimension_numbers = #tpu.dot_dimension_numbers<[1], [0], [0], [1], [0, 0, 1, 1], [], []>} : vector<32x256xf32>, vector<256x128xf32>, vector<32x128xf32> -> vector<32x128xf32>
    %c0_41 = arith.constant 0 : index
    %c0_42 = arith.constant 0 : index
    %81 = vector.load %arg11[%c0_41, %c0_42] : memref<1x128xf32, #tpu.memory_space<vmem>>, vector<1x128xf32>
    %82 = vector.broadcast %81 : vector<1x128xf32> to vector<32x128xf32>
    %83 = arith.addf %80, %82 : vector<32x128xf32>
    %cst_43 = arith.constant 0.000000e+00 : f32
    %84 = vector.broadcast %cst_43 : f32 to vector<32x128xf32>
    %85 = arith.maximumf %83, %84 : vector<32x128xf32>
    %c0_44 = arith.constant 0 : index
    %c0_45 = arith.constant 0 : index
    %86 = vector.load %arg12[%c0_44, %c0_45] : memref<128x128xf32, #tpu.memory_space<vmem>>, vector<128x128xf32>
    %cst_46 = arith.constant dense<0.000000e+00> : vector<32x128xf32>
    %87 = tpu.matmul %55, %86, %cst_46 {dimension_numbers = #tpu.dot_dimension_numbers<[1], [0], [0], [1], [0, 0, 1, 1], [], []>} : vector<32x128xf32>, vector<128x128xf32>, vector<32x128xf32> -> vector<32x128xf32>
    %c0_47 = arith.constant 0 : index
    %c0_48 = arith.constant 0 : index
    %88 = vector.load %arg13[%c0_47, %c0_48] : memref<1x128xf32, #tpu.memory_space<vmem>>, vector<1x128xf32>
    %89 = vector.broadcast %88 : vector<1x128xf32> to vector<32x128xf32>
    %90 = arith.addf %87, %89 : vector<32x128xf32>
    %91 = arith.addf %85, %90 : vector<32x128xf32>
    %cst_49 = arith.constant 0.000000e+00 : f32
    %92 = vector.broadcast %cst_49 : f32 to vector<32x128xf32>
    %93 = arith.maximumf %91, %92 : vector<32x128xf32>
    %c4_i32 = arith.constant 4 : i32
    %94 = tpu.dynamic_rotate %93 by %c4_i32 dim 0 : vector<32x128xf32>, i32 -> vector<32x128xf32>
    %c4_i32_50 = arith.constant 4 : i32
    %95 = vector.broadcast %c4_i32_50 : i32 to vector<32x1xi32>
    %96 = arith.cmpi slt, %16, %95 : vector<32x1xi32>
    %cst_51 = arith.constant 0.000000e+00 : f32
    %97 = vector.shape_cast %96 : vector<32x1xi1> to vector<32x1xi1>
    %98 = vector.broadcast %97 : vector<32x1xi1> to vector<32x128xi1>
    %99 = vector.broadcast %cst_51 : f32 to vector<32x128xf32>
    %100 = arith.select %98, %99, %94 : vector<32x128xi1>, vector<32x128xf32>
    %101 = tpu.concatenate %100, %93 in 1 : vector<32x128xf32>, vector<32x128xf32> -> vector<32x256xf32>
    %c0_52 = arith.constant 0 : index
    %c0_53 = arith.constant 0 : index
    %102 = vector.load %arg14[%c0_52, %c0_53] : memref<256x128xf32, #tpu.memory_space<vmem>>, vector<256x128xf32>
    %cst_54 = arith.constant dense<0.000000e+00> : vector<32x128xf32>
    %103 = tpu.matmul %101, %102, %cst_54 {dimension_numbers = #tpu.dot_dimension_numbers<[1], [0], [0], [1], [0, 0, 1, 1], [], []>} : vector<32x256xf32>, vector<256x128xf32>, vector<32x128xf32> -> vector<32x128xf32>
    %c0_55 = arith.constant 0 : index
    %c0_56 = arith.constant 0 : index
    %104 = vector.load %arg15[%c0_55, %c0_56] : memref<1x128xf32, #tpu.memory_space<vmem>>, vector<1x128xf32>
    %105 = vector.broadcast %104 : vector<1x128xf32> to vector<32x128xf32>
    %106 = arith.addf %103, %105 : vector<32x128xf32>
    %cst_57 = arith.constant 0.000000e+00 : f32
    %107 = vector.broadcast %cst_57 : f32 to vector<32x128xf32>
    %108 = arith.maximumf %106, %107 : vector<32x128xf32>
    %c4_i32_58 = arith.constant 4 : i32
    %109 = tpu.dynamic_rotate %108 by %c4_i32_58 dim 0 : vector<32x128xf32>, i32 -> vector<32x128xf32>
    %c4_i32_59 = arith.constant 4 : i32
    %110 = vector.broadcast %c4_i32_59 : i32 to vector<32x1xi32>
    %111 = arith.cmpi slt, %16, %110 : vector<32x1xi32>
    %cst_60 = arith.constant 0.000000e+00 : f32
    %112 = vector.shape_cast %111 : vector<32x1xi1> to vector<32x1xi1>
    %113 = vector.broadcast %112 : vector<32x1xi1> to vector<32x128xi1>
    %114 = vector.broadcast %cst_60 : f32 to vector<32x128xf32>
    %115 = arith.select %113, %114, %109 : vector<32x128xi1>, vector<32x128xf32>
    %116 = tpu.concatenate %115, %108 in 1 : vector<32x128xf32>, vector<32x128xf32> -> vector<32x256xf32>
    %c0_61 = arith.constant 0 : index
    %c0_62 = arith.constant 0 : index
    %117 = vector.load %arg16[%c0_61, %c0_62] : memref<256x128xf32, #tpu.memory_space<vmem>>, vector<256x128xf32>
    %cst_63 = arith.constant dense<0.000000e+00> : vector<32x128xf32>
    %118 = tpu.matmul %116, %117, %cst_63 {dimension_numbers = #tpu.dot_dimension_numbers<[1], [0], [0], [1], [0, 0, 1, 1], [], []>} : vector<32x256xf32>, vector<256x128xf32>, vector<32x128xf32> -> vector<32x128xf32>
    %c0_64 = arith.constant 0 : index
    %c0_65 = arith.constant 0 : index
    %119 = vector.load %arg17[%c0_64, %c0_65] : memref<1x128xf32, #tpu.memory_space<vmem>>, vector<1x128xf32>
    %120 = vector.broadcast %119 : vector<1x128xf32> to vector<32x128xf32>
    %121 = arith.addf %118, %120 : vector<32x128xf32>
    %cst_66 = arith.constant 0.000000e+00 : f32
    %122 = vector.broadcast %cst_66 : f32 to vector<32x128xf32>
    %123 = arith.maximumf %121, %122 : vector<32x128xf32>
    %124 = arith.addf %123, %93 : vector<32x128xf32>
    %cst_67 = arith.constant 0.000000e+00 : f32
    %125 = vector.broadcast %cst_67 : f32 to vector<32x128xf32>
    %126 = arith.maximumf %124, %125 : vector<32x128xf32>
    %c0_68 = arith.constant 0 : index
    %c0_69 = arith.constant 0 : index
    %127 = vector.load %arg18[%c0_68, %c0_69] : memref<128x128xf32, #tpu.memory_space<vmem>>, vector<128x128xf32>
    %cst_70 = arith.constant dense<0.000000e+00> : vector<32x128xf32>
    %128 = tpu.matmul %126, %127, %cst_70 {dimension_numbers = #tpu.dot_dimension_numbers<[1], [0], [0], [1], [0, 0, 1, 1], [], []>} : vector<32x128xf32>, vector<128x128xf32>, vector<32x128xf32> -> vector<32x128xf32>
    %c0_71 = arith.constant 0 : index
    %c0_72 = arith.constant 0 : index
    %129 = vector.load %arg19[%c0_71, %c0_72] : memref<1x128xf32, #tpu.memory_space<vmem>>, vector<1x128xf32>
    %130 = vector.broadcast %129 : vector<1x128xf32> to vector<32x128xf32>
    %131 = arith.addf %128, %130 : vector<32x128xf32>
    %cst_73 = arith.constant 0.000000e+00 : f32
    %132 = vector.broadcast %cst_73 : f32 to vector<32x128xf32>
    %133 = arith.subf %132, %131 : vector<32x128xf32>
    %134 = math.exp %133 : vector<32x128xf32>
    %cst_74 = arith.constant 1.000000e+00 : f32
    %135 = vector.broadcast %cst_74 : f32 to vector<32x128xf32>
    %136 = arith.addf %135, %134 : vector<32x128xf32>
    %cst_75 = arith.constant 1.000000e+00 : f32
    %137 = vector.broadcast %cst_75 : f32 to vector<32x128xf32>
    %138 = arith.divf %137, %136 : vector<32x128xf32>
    %c0_76 = arith.constant 0 : index
    %c0_77 = arith.constant 0 : index
    %139 = vector.load %arg20[%c0_76, %c0_77] : memref<32x128xf32, #tpu.memory_space<vmem>>, vector<32x128xf32>
    tpu.vector_store %arg20[%c0_76, %c0_77], %138 {strides = array<i32>} : memref<32x128xf32, #tpu.memory_space<vmem>>, vector<32x128xf32>,
    return
  }
  func.func @transform_0(%arg0: i32) -> (i32, i32) {
    %c0_i32 = arith.constant 0 : i32
    %c0_i32_0 = arith.constant 0 : i32
    return %arg0, %c0_i32 : i32, i32
  }
  func.func @transform_1(%arg0: i32) -> (i32, i32) {
    %c0_i32 = arith.constant 0 : i32
    %c0_i32_0 = arith.constant 0 : i32
    %c0_i32_1 = arith.constant 0 : i32
    return %c0_i32, %c0_i32_0 : i32, i32
  }
  func.func @transform_2(%arg0: i32) -> (i32, i32) {
    %c0_i32 = arith.constant 0 : i32
    %c0_i32_0 = arith.constant 0 : i32
    %c0_i32_1 = arith.constant 0 : i32
    return %c0_i32, %c0_i32_0 : i32, i32
  }
  func.func @transform_3(%arg0: i32) -> (i32, i32) {
    %c0_i32 = arith.constant 0 : i32
    %c0_i32_0 = arith.constant 0 : i32
    %c0_i32_1 = arith.constant 0 : i32
    return %c0_i32, %c0_i32_0 : i32, i32
  }
  func.func @transform_4(%arg0: i32) -> (i32, i32) {
    %c0_i32 = arith.constant 0 : i32
    %c0_i32_0 = arith.constant 0 : i32
    %c0_i32_1 = arith.constant 0 : i32
    return %c0_i32, %c0_i32_0 : i32, i32
  }
  func.func @transform_5(%arg0: i32) -> (i32, i32) {
    %c0_i32 = arith.constant 0 : i32
    %c0_i32_0 = arith.constant 0 : i32
    %c0_i32_1 = arith.constant 0 : i32
    return %c0_i32, %c0_i32_0 : i32, i32
  }
  func.func @transform_6(%arg0: i32) -> (i32, i32) {
    %c0_i32 = arith.constant 0 : i32
    %c0_i32_0 = arith.constant 0 : i32
    %c0_i32_1 = arith.constant 0 : i32
    return %c0_i32, %c0_i32_0 : i32, i32
  }
  func.func @transform_7(%arg0: i32) -> (i32, i32) {
    %c0_i32 = arith.constant 0 : i32
    %c0_i32_0 = arith.constant 0 : i32
    %c0_i32_1 = arith.constant 0 : i32
    return %c0_i32, %c0_i32_0 : i32, i32
  }
  func.func @transform_8(%arg0: i32) -> (i32, i32) {
    %c0_i32 = arith.constant 0 : i32
    %c0_i32_0 = arith.constant 0 : i32
    %c0_i32_1 = arith.constant 0 : i32
    return %c0_i32, %c0_i32_0 : i32, i32
  }
  func.func @transform_9(%arg0: i32) -> (i32, i32) {
    %c0_i32 = arith.constant 0 : i32
    %c0_i32_0 = arith.constant 0 : i32
    %c0_i32_1 = arith.constant 0 : i32
    return %c0_i32, %c0_i32_0 : i32, i32
  }
  func.func @transform_10(%arg0: i32) -> (i32, i32) {
    %c0_i32 = arith.constant 0 : i32
    %c0_i32_0 = arith.constant 0 : i32
    %c0_i32_1 = arith.constant 0 : i32
    return %c0_i32, %c0_i32_0 : i32, i32
  }
  func.func @transform_11(%arg0: i32) -> (i32, i32) {
    %c0_i32 = arith.constant 0 : i32
    %c0_i32_0 = arith.constant 0 : i32
    %c0_i32_1 = arith.constant 0 : i32
    return %c0_i32, %c0_i32_0 : i32, i32
  }
  func.func @transform_12(%arg0: i32) -> (i32, i32) {
    %c0_i32 = arith.constant 0 : i32
    %c0_i32_0 = arith.constant 0 : i32
    %c0_i32_1 = arith.constant 0 : i32
    return %c0_i32, %c0_i32_0 : i32, i32
  }
  func.func @transform_13(%arg0: i32) -> (i32, i32) {
    %c0_i32 = arith.constant 0 : i32
    %c0_i32_0 = arith.constant 0 : i32
    %c0_i32_1 = arith.constant 0 : i32
    return %c0_i32, %c0_i32_0 : i32, i32
  }
  func.func @transform_14(%arg0: i32) -> (i32, i32) {
    %c0_i32 = arith.constant 0 : i32
    %c0_i32_0 = arith.constant 0 : i32
    %c0_i32_1 = arith.constant 0 : i32
    return %c0_i32, %c0_i32_0 : i32, i32
  }
  func.func @transform_15(%arg0: i32) -> (i32, i32) {
    %c0_i32 = arith.constant 0 : i32
    %c0_i32_0 = arith.constant 0 : i32
    %c0_i32_1 = arith.constant 0 : i32
    return %c0_i32, %c0_i32_0 : i32, i32
  }
  func.func @transform_16(%arg0: i32) -> (i32, i32) {
    %c0_i32 = arith.constant 0 : i32
    %c0_i32_0 = arith.constant 0 : i32
    %c0_i32_1 = arith.constant 0 : i32
    return %c0_i32, %c0_i32_0 : i32, i32
  }
  func.func @transform_17(%arg0: i32) -> (i32, i32) {
    %c0_i32 = arith.constant 0 : i32
    %c0_i32_0 = arith.constant 0 : i32
    %c0_i32_1 = arith.constant 0 : i32
    return %c0_i32, %c0_i32_0 : i32, i32
  }
  func.func @transform_18(%arg0: i32) -> (i32, i32) {
    %c0_i32 = arith.constant 0 : i32
    %c0_i32_0 = arith.constant 0 : i32
    %c0_i32_1 = arith.constant 0 : i32
    return %c0_i32, %c0_i32_0 : i32, i32
  }
  func.func @transform_19(%arg0: i32) -> (i32, i32) {
    %c0_i32 = arith.constant 0 : i32
    %c0_i32_0 = arith.constant 0 : i32
    return %arg0, %c0_i32 : i32, i32
  }
}

</mosaic_0001>

<bundles_post_ra>
// kernel: tpu_custom_call.1
= control target key start
LH: loop header
LB: loop body
LE: loop exit
PB: predicated region body
PF: predicated region fallthrough
CT: control target
= control target key end

     0   :  { %s1958_s0 = inlined_call_operand.hbm [shape: f32[32,128], index: 0, kind: input, shape index: {}]   ;;  %s1959_s1 = inlined_call_operand.hbm [shape: f32[256,128], index: 1, kind: input, shape index: {}]   ;;  %s1960_s2 = inlined_call_operand.vmem [shape: f32[1,128], index: 2, kind: input, shape index: {}]   ;;  %s1961_s3 = inlined_call_operand.hbm [shape: f32[256,128], index: 3, kind: input, shape index: {}]   ;;  %s1962_s4 = inlined_call_operand.vmem [shape: f32[1,128], index: 4, kind: input, shape index: {}]   ;;  %s1963_s5 = inlined_call_operand.hbm [shape: f32[128,128], index: 5, kind: input, shape index: {}]   ;;  %s1964_s6 = inlined_call_operand.vmem [shape: f32[1,128], index: 6, kind: input, shape index: {}]   ;;  %s1965_s7 = inlined_call_operand.hbm [shape: f32[256,128], index: 7, kind: input, shape index: {}]   ;;  %s1966_s8 = inlined_call_operand.vmem [shape: f32[1,128], index: 8, kind: input, shape index: {}]   ;;  %s1967_s9 = inlined_call_operand.hbm [shape: f32[256,128], index: 9, kind: input, shape index: {}]   ;;  %s1968_s10 = inlined_call_operand.vmem [shape: f32[1,128], index: 10, kind: input, shape index: {}]   ;;  %s1969_s11 = inlined_call_operand.hbm [shape: f32[128,128], index: 11, kind: input, shape index: {}]   ;;  %s1970_s12 = inlined_call_operand.vmem [shape: f32[1,128], index: 12, kind: input, shape index: {}]   ;;  %s1971_s13 = inlined_call_operand.hbm [shape: f32[256,128], index: 13, kind: input, shape index: {}]   ;;  %s1972_s14 = inlined_call_operand.vmem [shape: f32[1,128], index: 14, kind: input, shape index: {}]   ;;  %s1973_s15 = inlined_call_operand.hbm [shape: f32[256,128], index: 15, kind: input, shape index: {}]   ;;  %s1974_s16 = inlined_call_operand.vmem [shape: f32[1,128], index: 16, kind: input, shape index: {}]   ;;  %s1975_s17 = inlined_call_operand.hbm [shape: f32[128,128], index: 17, kind: input, shape index: {}]   ;;  %s1976_s18 = inlined_call_operand.vmem [shape: f32[1,128], index: 18, kind: input, shape index: {}]   ;;  %s1977_s19 = inlined_call_operand.hbm [shape: f32[32,128], index: 19, kind: output, shape index: {}]  }
   0x1   :  { %1978 = sst [smem:[#allocation27_spill]] %s1958_s0 }
   0x2   :  { %1979 = sst [smem:[#allocation28_spill]] %s1959_s1 }
   0x3   :  { %1980 = sst [smem:[#allocation29_spill]] %s1960_s2 }
   0x4   :  { %1981 = sst [smem:[#allocation30_spill]] %s1961_s3 }
   0x5   :  { %24 = vsyncpa [#allocation3], 0 }
   0x6   :  { %25 = vsyncpa [#allocation6], 0 }
   0x7   :  { %26 = vsyncpa [#allocation9], 0 }
   0x8   :  { %27 = vsyncpa [#allocation12], 0 }
   0x9   :  { %28 = vsyncpa [#allocation15], 0 }
   0xa   :  { %29 = vsyncpa [#allocation18], 0 }
   0xb   :  { %30 = vsyncpa [#allocation4], 0  ;;  %s1982_s20 = sld [smem:[#allocation28_spill]]  ;;  %s1612_s1 = smov [#allocation5]  }
   0xc   :  { %s50_s22 = sshll.u32 %s1612_s1, 4  ;;  %s78_s24 = sshll.u32 %s1963_s5, 4  ;;  %s51_s22 = int_to_ptr.vmem [resolvable:$true] %s50_s22  ;;  %s79_s24 = int_to_ptr.hbm [resolvable:$true] %s78_s24 }
   0xd   :  { %s1613_s25 = smov 128   ;;  %s1614_s3 = smov 8  }
   0xe   :  { %s1615_s26 = smov [#allocation8]   ;;  %s108_s0 = sshll.u32 %s1967_s9, 4  ;;  %s109_s0 = int_to_ptr.hbm [resolvable:$true] %s108_s0 }
   0xf   :  { %s80_s27 = sshll.u32 %s1615_s26, 4  ;;  %s1616_s1 = smov [#allocation11]   ;;  %s81_s27 = int_to_ptr.vmem [resolvable:$true] %s80_s27 }
  0x10   :  { %86 = dma.hbm_to_vmem [thread:$0]  %s79_s24, 2048, %s81_s27, [#allocation9], %s1613_s25, %s1613_s25, %s1614_s3  }
  0x11   :  { %s48_s21 = sshll.u32 %s1982_s20, 4  ;;  %s138_s20 = sshll.u32 %s1971_s13, 4  ;;  %s49_s21 = int_to_ptr.hbm [resolvable:$true] %s48_s21  ;;  %s139_s20 = int_to_ptr.hbm [resolvable:$true] %s138_s20 }
  0x12   :  { %56 = dma.hbm_to_vmem [thread:$0]  %s49_s21, 4096, %s51_s22, [#allocation6], %s1613_s25, %s1613_s25, %s1614_s3  }
  0x13   :  { %s110_s2 = sshll.u32 %s1616_s1, 4  ;;  %s1617_s21 = smov [#allocation14]   ;;  %s111_s2 = int_to_ptr.vmem [resolvable:$true] %s110_s2 }
  0x14   :  { %116 = dma.hbm_to_vmem [thread:$0]  %s109_s0, 4096, %s111_s2, [#allocation12], %s1613_s25, %s1613_s25, %s1614_s3  }
  0x15   :  { %s140_s9 = sshll.u32 %s1617_s21, 4  ;;  %s1983_s26 = sld [smem:[#allocation27_spill]]  ;;  %s141_s9 = int_to_ptr.vmem [resolvable:$true] %s140_s9 }
  0x16   :  { %146 = dma.hbm_to_vmem [thread:$0]  %s139_s20, 4096, %s141_s9, [#allocation15], %s1613_s25, %s1613_s25, %s1614_s3  }
  0x17   :  { %s1984_s27 = sld [smem:[#allocation30_spill]]  ;;  %s1618_s5 = smov [#allocation2]  }
  0x18   :  { %s37_s30 = sshll.u32 %s1618_s5, 4  ;;  %s1619_s0 = smov [#allocation7]   ;;  %s38_s30 = int_to_ptr.vmem [resolvable:$true] %s37_s30 }
  0x19   :  { %s65_s1 = sshll.u32 %s1619_s0, 4  ;;  %s93_s22 = sshll.u32 %s1965_s7, 4  ;;  %s66_s1 = int_to_ptr.vmem [resolvable:$true] %s65_s1  ;;  %s94_s22 = int_to_ptr.hbm [resolvable:$true] %s93_s22 }
  0x1a   :  { %s123_s23 = sshll.u32 %s1969_s11, 4  ;;  %s153_s5 = sshll.u32 %s1973_s15, 4  ;;  %s124_s23 = int_to_ptr.hbm [resolvable:$true] %s123_s23  ;;  %s154_s5 = int_to_ptr.hbm [resolvable:$true] %s153_s5 }
  0x1b   :  { %s35_s28 = sshll.u32 %s1983_s26, 4  ;;  %s1620_s26 = smov [#allocation10]   ;;  %s36_s28 = int_to_ptr.hbm [resolvable:$true] %s35_s28 }
  0x1c   :  { %43 = dma.hbm_to_vmem [thread:$0]  %s36_s28, 512, %s38_s30, [#allocation3], %s1613_s25, %s1613_s25, %s1614_s3  }
  0x1d   :  { %s63_s29 = sshll.u32 %s1984_s27, 4  ;;  %s95_s13 = sshll.u32 %s1620_s26, 4  ;;  %s64_s29 = int_to_ptr.hbm [resolvable:$true] %s63_s29  ;;  %s96_s13 = int_to_ptr.vmem [resolvable:$true] %s95_s13 }
  0x1e   :  { %71 = dma.hbm_to_vmem [thread:$0]  %s64_s29, 4096, %s66_s1, [#allocation6], %s1613_s25, %s1613_s25, %s1614_s3  }
  0x1f   :  { %101 = dma.hbm_to_vmem [thread:$0]  %s94_s22, 4096, %s96_s13, [#allocation9], %s1613_s25, %s1613_s25, %s1614_s3  }
  0x20   :  { %s1621_s28 = smov [#allocation13]   ;;  %s168_s30 = sshll.u32 %s1975_s17, 4  ;;  %s169_s30 = int_to_ptr.hbm [resolvable:$true] %s168_s30 }
  0x21   :  { %s125_s7 = sshll.u32 %s1621_s28, 4  ;;  %s1622_s0 = smov [#allocation16]   ;;  %s126_s7 = int_to_ptr.vmem [resolvable:$true] %s125_s7 }
  0x22   :  { %131 = dma.hbm_to_vmem [thread:$0]  %s124_s23, 2048, %s126_s7, [#allocation12], %s1613_s25, %s1613_s25, %s1614_s3  }
  0x23   :  { %s155_s1 = sshll.u32 %s1622_s0, 4  ;;  %s1623_s2 = smov [#allocation17]   ;;  %s156_s1 = int_to_ptr.vmem [resolvable:$true] %s155_s1 }
  0x24   :  { %161 = dma.hbm_to_vmem [thread:$0]  %s154_s5, 4096, %s156_s1, [#allocation15], %s1613_s25, %s1613_s25, %s1614_s3  }
  0x25   :  { %s170_s15 = sshll.u32 %s1623_s2, 4  ;;  %s171_s15 = int_to_ptr.vmem [resolvable:$true] %s170_s15 }
  0x26   :  { %176 = dma.hbm_to_vmem [thread:$0]  %s169_s30, 2048, %s171_s15, [#allocation18], %s1613_s25, %s1613_s25, %s1614_s3  }
  0x27   :  { %1598 = dma.done.wait [#allocation3], 512  }
  0x28   :  { %1599 = vsyncadd [#allocation3], 4294966784 }
  0x29   :  { %1600 = dma.done.wait [#allocation6], 8192  }
  0x2a   :  { %1601 = vsyncadd [#allocation6], 4294959104 }
  0x2b   :  { %1602 = dma.done.wait [#allocation9], 6144  }
  0x2c   :  { %1603 = vsyncadd [#allocation9], 4294961152 }
  0x2d   :  { %1604 = dma.done.wait [#allocation12], 6144  }
  0x2e   :  { %1605 = vsyncadd [#allocation12], 4294961152 }
  0x2f   :  { %1606 = dma.done.wait [#allocation15], 8192  }
  0x30   :  { %1607 = vsyncadd [#allocation15], 4294959104 }
  0x31   :  { %1608 = dma.done.wait [#allocation18], 2048  }
  0x32   :  { %1609 = vsyncadd [#allocation18], 4294965248  ;;  %v316_v0 = vld [vmem:[#allocation5 + $0x78] sm:$0xff]  ;;  %v315_v1 = vld [vmem:[#allocation5 + $0x70] sm:$0xff]  ;;  %v219_v20 = vlaneseq  ;;  %s1985_s22 = sld [smem:[#allocation29_spill]]  ;;  %s1232_s30 = sshll.u32 %s1977_s19, 4  ;;  %s1233_s30 = int_to_ptr.hbm [resolvable:$true] %s1232_s30 }
  0x33   :  { %v332_v2 = vld [vmem:[#allocation5 + $0xf8] sm:$0xff]  ;;  %337 = vmatpush.msra.mxu0 %v316_v0  ;;  %v331_v3 = vld [vmem:[#allocation5 + $0xf0] sm:$0xff]  ;;  %v314_v4 = vld [vmem:[#allocation5 + $0x68] sm:$0xff] }
  0x34   :  { %366 = vmatpush.msra.mxu1 %v332_v2  ;;  %v330_v5 = vld [vmem:[#allocation5 + $0xe8] sm:$0xff]  ;;  %v313_v6 = vld [vmem:[#allocation5 + $0x60] sm:$0xff]  ;;  %v312_v8 = vld [vmem:[#allocation5 + $0x58] sm:$0xff]  ;;  %v1785_v26 = vshrl.u32 %v219_v20, 7 }
  0x35   :  { %338 = vmatpush.msra.mxu0 %v315_v1  ;;  %v329_v7 = vld [vmem:[#allocation5 + $0xe0] sm:$0xff]  ;;  %v328_v9 = vld [vmem:[#allocation5 + $0xd8] sm:$0xff]  ;;  %v311_v10 = vld [vmem:[#allocation5 + $0x50] sm:$0xff] }
  0x36   :  { %367 = vmatpush.msra.mxu1 %v331_v3  ;;  %v327_v11 = vld [vmem:[#allocation5 + $0xd0] sm:$0xff]  ;;  %v310_v12 = vld [vmem:[#allocation5 + $0x48] sm:$0xff]  ;;  %v309_v14 = vld [vmem:[#allocation5 + $0x40] sm:$0xff]  ;;  %v1792_v33 = vand.u32 15, %v1785_v26  ;;  %vm280_vm0 = vcmp.lt.s32.totalorder %v1785_v26, 1  ;;  %v222_v50 = vadd.s32 16, %v1785_v26 }
  0x37   :  { %339 = vmatpush.msra.mxu0 %v314_v4  ;;  %v326_v13 = vld [vmem:[#allocation5 + $0xc8] sm:$0xff]  ;;  %v308_v15 = vld [vmem:[#allocation5 + $0x38] sm:$0xff]  ;;  %v325_v16 = vld [vmem:[#allocation5 + $0xc0] sm:$0xff]  ;;  %vm570_vm4 = vcmp.lt.s32.totalorder %v1785_v26, 2  ;;  %vm860_vm7 = vcmp.lt.s32.totalorder %v1785_v26, 4 }
  0x38   :  { %368 = vmatpush.msra.mxu1 %v330_v5  ;;  %v324_v17 = vld [vmem:[#allocation5 + $0xb8] sm:$0xff]  ;;  %v307_v18 = vld [vmem:[#allocation5 + $0x30] sm:$0xff]  ;;  %v306_v21 = vld [vmem:[#allocation5 + $0x28] sm:$0xff]  ;;  %vm1274_vm1 = vcmp.ge.s32.totalorder %v1792_v33, 1  ;;  %v1812_v54 = vand.u32 15, %v222_v50  ;;  %vm1276_vm3 = vcmp.ge.s32.totalorder %v1792_v33, 2 }
  0x39   :  { %340 = vmatpush.msra.mxu0 %v313_v6  ;;  %v323_v19 = vld [vmem:[#allocation5 + $0xb0] sm:$0xff]  ;;  %v322_v22 = vld [vmem:[#allocation5 + $0xa8] sm:$0xff]  ;;  %v305_v23 = vld [vmem:[#allocation5 + $0x20] sm:$0xff]  ;;  %vm1278_vm6 = vcmp.ge.s32.totalorder %v1792_v33, 4 }
  0x3a   :  { %369 = vmatpush.msra.mxu1 %v329_v7  ;;  %v321_v24 = vld [vmem:[#allocation5 + $0xa0] sm:$0xff]  ;;  %v304_v25 = vld [vmem:[#allocation5 + $0x18] sm:$0xff]  ;;  %v303_v30 = vld [vmem:[#allocation5 + $0x10] sm:$0xff]  ;;  %vm1275_vm2 = vcmp.ge.s32.totalorder %v1812_v54, 1  ;;  %vm1277_vm5 = vcmp.ge.s32.totalorder %v1812_v54, 2  ;;  %vm1279_vm8 = vcmp.ge.s32.totalorder %v1812_v54, 4 }
  0x3b   :  { %341 = vmatpush.msra.mxu0 %v312_v8  ;;  %v320_v27 = vld [vmem:[#allocation5 + $0x98] sm:$0xff]  ;;  %v1787_v28 = vld [vmem:[#allocation2] sm:$0xff]  ;;  %v319_v31 = vld [vmem:[#allocation5 + $0x90] sm:$0xff] }
  0x3c   :  { %370 = vmatpush.msra.mxu1 %v328_v9  ;;  %v1789_v29 = vld [vmem:[#allocation2 + $0x18] sm:$0xff]  ;;  %v276_v34 = vrot.slane %v1787_v28, 7  ;;  %v441_v36 = vld [vmem:[#allocation7 + $0xf0] sm:$0xff]  ;;  %v302_v37 = vld [vmem:[#allocation5 + $0x8] sm:$0xff] }
  0x3d   :  { %342 = vmatpush.msra.mxu0 %v311_v10  ;;  %v442_v32 = vld [vmem:[#allocation7 + $0xf8] sm:$0xff]  ;;  %v279_v35 = vrot.slane %v1789_v29, 7  ;;  %v318_v38 = vld [vmem:[#allocation5 + $0x88] sm:$0xff]  ;;  %v301_v40 = vld [vmem:[#allocation5] sm:$0xff] }
  0x3e   :  { %371 = vmatpush.msra.mxu1 %v327_v11  ;;  %476 = vmatpush.msra.mxu3 %v442_v32  ;;  %v440_v39 = vld [vmem:[#allocation7 + $0xe8] sm:$0xff]  ;;  %v317_v41 = vld [vmem:[#allocation5 + $0x80] sm:$0xff]  ;;  %v438_v45 = vld [vmem:[#allocation7 + $0xd8] sm:$0xff] }
  0x3f   :  { %343 = vmatpush.msra.mxu0 %v310_v12  ;;  %v284_v42 = vsel %vm280_vm0, %v279_v35, %v276_v34  ;;  %v1800_v43 = vld [vmem:[#allocation2 + $0x8] sm:$0xff]  ;;  %v439_v44 = vld [vmem:[#allocation7 + $0xe0] sm:$0xff]  ;;  %v437_v47 = vld [vmem:[#allocation7 + $0xd0] sm:$0xff] }
  0x40   :  { %372 = vmatpush.msra.mxu1 %v326_v13  ;;  %477 = vmatpush.msra.mxu3 %v441_v36  ;;  %v277_v46 = vrot.slane %v1800_v43, 7  ;;  %v436_v48 = vld [vmem:[#allocation7 + $0xc8] sm:$0xff]  ;;  %v1809_v51 = vld [vmem:[#allocation2 + $0x10] sm:$0xff]  ;;  %v435_v52 = vld [vmem:[#allocation7 + $0xc0] sm:$0xff] }
  0x41   :  { %344 = vmatpush.msra.mxu0 %v309_v14  ;;  %v434_v53 = vld [vmem:[#allocation7 + $0xb8] sm:$0xff]  ;;  %v278_v55 = vrot.slane %v1809_v51, 7  ;;  %v433_v56 = vld [vmem:[#allocation7 + $0xb0] sm:$0xff]  ;;  %v432_v57 = vld [vmem:[#allocation7 + $0xa8] sm:$0xff] }
  0x42   :  { %373 = vmatpush.msra.mxu1 %v325_v16  ;;  %478 = vmatpush.msra.mxu3 %v440_v39  ;;  %v283_v49 = vsel %vm280_vm0, %v276_v34, %v277_v46  ;;  %v431_v59 = vld [vmem:[#allocation7 + $0xa0] sm:$0xff]  ;;  %v430_v61 = vld [vmem:[#allocation7 + $0x98] sm:$0xff]  ;;  %v429_v62 = vld [vmem:[#allocation7 + $0x90] sm:$0xff] }
  0x43   :  { %345 = vmatpush.msra.mxu0 %v308_v15  ;;  %v282_v58 = vsel %vm280_vm0, %v277_v46, %v278_v55  ;;  %v281_v60 = vsel %vm280_vm0, %v278_v55, %v279_v35  ;;  %v426_v63 = vld [vmem:[#allocation7 + $0x78] sm:$0xff]  ;;  %v428_v0 = vld [vmem:[#allocation7 + $0x88] sm:$0xff]  ;;  %v425_v1 = vld [vmem:[#allocation7 + $0x70] sm:$0xff] }
  0x44   :  { %374 = vmatpush.msra.mxu1 %v324_v17  ;;  %479 = vmatpush.msra.mxu3 %v439_v44  ;;  %v427_v2 = vld [vmem:[#allocation7 + $0x80] sm:$0xff]  ;;  %v424_v3 = vld [vmem:[#allocation7 + $0x68] sm:$0xff]  ;;  %v422_v5 = vld [vmem:[#allocation7 + $0x58] sm:$0xff] }
  0x45   :  { %346 = vmatpush.msra.mxu0 %v307_v18  ;;  %447 = vmatpush.msra.mxu2 %v426_v63  ;;  %v423_v4 = vld [vmem:[#allocation7 + $0x60] sm:$0xff]  ;;  %v524_v6 = vld [vmem:[#allocation8 + $0x78] sm:$0xff]  ;;  %v421_v7 = vld [vmem:[#allocation7 + $0x50] sm:$0xff] }
  0x46   :  { %375 = vmatpush.msra.mxu1 %v323_v19  ;;  %480 = vmatpush.msra.mxu3 %v438_v45  ;;  %v523_v8 = vld [vmem:[#allocation8 + $0x70] sm:$0xff]  ;;  %v420_v9 = vld [vmem:[#allocation7 + $0x48] sm:$0xff]  ;;  %v419_v11 = vld [vmem:[#allocation7 + $0x40] sm:$0xff] }
  0x47   :  { %347 = vmatpush.msra.mxu0 %v306_v21  ;;  %448 = vmatpush.msra.mxu2 %v425_v1  ;;  %v522_v10 = vld [vmem:[#allocation8 + $0x68] sm:$0xff]  ;;  %v521_v12 = vld [vmem:[#allocation8 + $0x60] sm:$0xff]  ;;  %v418_v13 = vld [vmem:[#allocation7 + $0x38] sm:$0xff] }
  0x48   :  { %376 = vmatpush.msra.mxu1 %v322_v22  ;;  %481 = vmatpush.msra.mxu3 %v437_v47  ;;  %v520_v14 = vld [vmem:[#allocation8 + $0x58] sm:$0xff]  ;;  %v417_v15 = vld [vmem:[#allocation7 + $0x30] sm:$0xff]  ;;  %v416_v17 = vld [vmem:[#allocation7 + $0x28] sm:$0xff] }
  0x49   :  { %348 = vmatpush.msra.mxu0 %v305_v23  ;;  %449 = vmatpush.msra.mxu2 %v424_v3  ;;  %v519_v16 = vld [vmem:[#allocation8 + $0x50] sm:$0xff]  ;;  %v518_v18 = vld [vmem:[#allocation8 + $0x48] sm:$0xff]  ;;  %v415_v19 = vld [vmem:[#allocation7 + $0x20] sm:$0xff] }
  0x4a   :  { %377 = vmatpush.msra.mxu1 %v321_v24  ;;  %482 = vmatpush.msra.mxu3 %v436_v48  ;;  %v517_v20 = vld [vmem:[#allocation8 + $0x40] sm:$0xff]  ;;  %v414_v21 = vld [vmem:[#allocation7 + $0x18] sm:$0xff]  ;;  %v413_v23 = vld [vmem:[#allocation7 + $0x10] sm:$0xff] }
  0x4b   :  { %349 = vmatpush.msra.mxu0 %v304_v25  ;;  %450 = vmatpush.msra.mxu2 %v423_v4  ;;  %v516_v22 = vld [vmem:[#allocation8 + $0x38] sm:$0xff]  ;;  %v1309_v24 = vld [vmem:[%s1985_s22] ss:$0 sm:$0xff]  ;;  %v515_v25 = vld [vmem:[#allocation8 + $0x30] sm:$0xff] }
  0x4c   :  { %378 = vmatpush.msra.mxu1 %v320_v27  ;;  %483 = vmatpush.msra.mxu3 %v435_v52  ;;  %v412_v27 = vld [vmem:[#allocation7 + $0x8] sm:$0xff]  ;;  %v513_v36 = vld [vmem:[#allocation8 + $0x20] sm:$0xff]  ;;  %v511_v39 = vld [vmem:[#allocation8 + $0x10] sm:$0xff] }
  0x4d   :  { %350 = vmatpush.msra.mxu0 %v303_v30  ;;  %451 = vmatpush.msra.mxu2 %v422_v5  ;;  %v514_v30 = vld [vmem:[#allocation8 + $0x28] sm:$0xff]  ;;  %v509_v46 = vld [vmem:[#allocation8] sm:$0xff]  ;;  %v621_v3 = vld [vmem:[#allocation10 + $0xf0] sm:$0xff] }
  0x4e   :  { %379 = vmatpush.msra.mxu1 %v319_v31  ;;  %484 = vmatpush.msra.mxu3 %v434_v53  ;;  %v411_v31 = vld [vmem:[#allocation7] sm:$0xff]  ;;  %v618_v5 = vld [vmem:[#allocation10 + $0xd8] sm:$0xff]  ;;  %v1103_v33 = vld [vmem:[#allocation17 + $0x30] sm:$0xff] }
  0x4f   :  { %351 = vmatpush.msra.mxu0 %v302_v37  ;;  %452 = vmatpush.msra.mxu2 %v421_v7  ;;  %v512_v37 = vld [vmem:[#allocation8 + $0x18] sm:$0xff]  ;;  %v619_v4 = vld [vmem:[#allocation10 + $0xe0] sm:$0xff]  ;;  %v616_v7 = vld [vmem:[#allocation10 + $0xc8] sm:$0xff] }
  0x50   :  { %380 = vmatpush.msra.mxu1 %v318_v38  ;;  %485 = vmatpush.msra.mxu3 %v433_v56  ;;  %v1109_v54 = vld [vmem:[#allocation17 + $0x60] sm:$0xff] }
  0x51   :  { %352 = vmatpush.msra.mxu0 %v301_v40  ;;  %453 = vmatpush.msra.mxu2 %v420_v9  ;;  %v614_v9 = vld [vmem:[#allocation10 + $0xb8] sm:$0xff]  ;;  %v1105_v26 = vld [vmem:[#allocation17 + $0x40] sm:$0xff] }
  0x52   :  { %381 = vmatpush.msra.mxu1 %v317_v41  ;;  %1251 = vmatmul.msk.f32.vlgmr.msra.gmra.mxu0 %vm1274_vm1, %v284_v42  ;;  %v510_v41 = vld [vmem:[#allocation8 + $0x8] sm:$0xff] }
  0x53   :  { %382 = vmatmul.f32.vlgmr.msra.gmra.mxu1 %v1787_v28  ;;  %486 = vmatpush.msra.mxu3 %v432_v57 }
  0x54   :  { %529 = vmatpush.msrb.mxu0 %v524_v6  ;;  %454 = vmatpush.msra.mxu2 %v419_v11  ;;  %v617_v6 = vld [vmem:[#allocation10 + $0xd0] sm:$0xff]  ;;  %v612_v11 = vld [vmem:[#allocation10 + $0xa8] sm:$0xff] }
  0x55   :  { %487 = vmatpush.msra.mxu3 %v431_v59 }
  0x56   :  { %530 = vmatpush.msrb.mxu0 %v523_v8  ;;  %455 = vmatpush.msra.mxu2 %v418_v13  ;;  %v615_v8 = vld [vmem:[#allocation10 + $0xc0] sm:$0xff]  ;;  %v610_v13 = vld [vmem:[#allocation10 + $0x98] sm:$0xff] }
  0x57   :  { %488 = vmatpush.msra.mxu3 %v430_v61 }
  0x58   :  { %531 = vmatpush.msrb.mxu0 %v522_v10  ;;  %456 = vmatpush.msra.mxu2 %v417_v15  ;;  %v613_v10 = vld [vmem:[#allocation10 + $0xb0] sm:$0xff]  ;;  %v606_v15 = vld [vmem:[#allocation10 + $0x78] sm:$0xff] }
  0x59   :  { %489 = vmatpush.msra.mxu3 %v429_v62  ;;  %627 = vmatpush.msrb.mxu1 %v606_v15 }
  0x5a   :  { %356 = vmatmul.f32.gmra.mxu0 %v283_v49  ;;  %457 = vmatpush.msra.mxu2 %v416_v17  ;;  %v605_v17 = vld [vmem:[#allocation10 + $0x70] sm:$0xff] }
  0x5b   :  { %385 = vmatmul.f32.gmra.mxu1 %v1800_v43  ;;  %490 = vmatpush.msra.mxu3 %v428_v0 }
  0x5c   :  { %532 = vmatpush.msrb.mxu0 %v521_v12  ;;  %458 = vmatpush.msra.mxu2 %v415_v19  ;;  %v611_v12 = vld [vmem:[#allocation10 + $0xa0] sm:$0xff]  ;;  %v604_v19 = vld [vmem:[#allocation10 + $0x68] sm:$0xff] }
  0x5d   :  { %491 = vmatpush.msra.mxu3 %v427_v2  ;;  %v622_v2 = vld [vmem:[#allocation10 + $0xf8] sm:$0xff]  ;;  %628 = vmatpush.msrb.mxu1 %v605_v17 }
  0x5e   :  { %533 = vmatpush.msrb.mxu0 %v520_v14  ;;  %459 = vmatpush.msra.mxu2 %v414_v21  ;;  %v609_v14 = vld [vmem:[#allocation10 + $0x90] sm:$0xff]  ;;  %v602_v21 = vld [vmem:[#allocation10 + $0x58] sm:$0xff] }
  0x5f   :  { %629 = vmatpush.msrb.mxu1 %v604_v19 }
  0x60   :  { %534 = vmatpush.msrb.mxu0 %v519_v16  ;;  %460 = vmatpush.msra.mxu2 %v413_v23  ;;  %v608_v16 = vld [vmem:[#allocation10 + $0x88] sm:$0xff] }
  0x61   :  { %v600_v23 = vld [vmem:[#allocation10 + $0x48] sm:$0xff] }
  0x62   :  { %1253 = vmatmul.msk.f32.gmra.mxu0 %vm1275_vm2, %v282_v58  ;;  %461 = vmatpush.msra.mxu2 %v412_v27  ;;  %v597_v27 = vld [vmem:[#allocation10 + $0x30] sm:$0xff] }
  0x63   :  { %388 = vmatmul.f32.gmra.mxu1 %v1809_v51  ;;  %535 = vmatpush.msrb.mxu0 %v518_v18  ;;  %v607_v18 = vld [vmem:[#allocation10 + $0x80] sm:$0xff] }
  0x64   :  { %462 = vmatpush.msra.mxu2 %v411_v31  ;;  %v596_v31 = vld [vmem:[#allocation10 + $0x28] sm:$0xff] }
  0x65   :  { %536 = vmatpush.msrb.mxu0 %v517_v20  ;;  %v603_v20 = vld [vmem:[#allocation10 + $0x60] sm:$0xff] }
  0x66   :  { %656 = vmatpush.msrb.mxu2 %v622_v2  ;;  %630 = vmatpush.msrb.mxu1 %v603_v20  ;;  %v802_v20 = vld [vmem:[#allocation13 + $0x18] sm:$0xff] }
  0x67   :  { %537 = vmatpush.msrb.mxu0 %v516_v22  ;;  %v601_v22 = vld [vmem:[#allocation10 + $0x50] sm:$0xff] }
  0x68   :  { %657 = vmatpush.msrb.mxu2 %v621_v3  ;;  %631 = vmatpush.msrb.mxu1 %v602_v21  ;;  %v801_v21 = vld [vmem:[#allocation13 + $0x10] sm:$0xff] }
  0x69   :  { %538 = vmatpush.msrb.mxu0 %v515_v25  ;;  %v598_v25 = vld [vmem:[#allocation10 + $0x38] sm:$0xff] }
  0x6a   :  { %362 = vmatmul.f32.gmra.mxu0 %v281_v60  ;;  %632 = vmatpush.msrb.mxu1 %v601_v22 }
  0x6b   :  { %391 = vmatmul.f32.gmra.mxu1 %v1789_v29  ;;  %539 = vmatpush.msrb.mxu0 %v514_v30 }
  0x6c   :  { %633 = vmatpush.msrb.mxu1 %v600_v23  ;;  %v800_v23 = vld [vmem:[#allocation13 + $0x8] sm:$0xff] }
  0x6d   :  { %540 = vmatpush.msrb.mxu0 %v513_v36  ;;  %v594_v36 = vld [vmem:[#allocation10 + $0x18] sm:$0xff] }
  0x6f   :  { %541 = vmatpush.msrb.mxu0 %v512_v37  ;;  %v1849_v37 = vld [vmem:[%s1964_s6] ss:$0 sm:$0xff] }
  0x71   :  { %542 = vmatpush.msrb.mxu0 %v511_v39  ;;  %v593_v39 = vld [vmem:[#allocation10 + $0x10] sm:$0xff] }
  0x73   :  { %543 = vmatpush.msrb.mxu0 %v510_v41  ;;  %v592_v41 = vld [vmem:[#allocation10 + $0x8] sm:$0xff] }
  0x75   :  { %544 = vmatpush.msrb.mxu0 %v509_v46 }
  0x76   :  { %545 = vmatmul.f32.vlgmr.msrb.gmra.mxu0 %v1787_v28 }
  0x7e   :  { %548 = vmatmul.f32.gmra.mxu0 %v1800_v43 }
  0x86   :  { %551 = vmatmul.f32.gmra.mxu0 %v1809_v51 }
  0x8e   :  { %554 = vmatmul.f32.gmra.mxu0 %v1789_v29  ;;  %v620_v29 = vld [vmem:[#allocation10 + $0xe8] sm:$0xff] }
  0x8f   :  { %658 = vmatpush.msrb.mxu2 %v620_v29  ;;  %v807_v29 = vld [vmem:[#allocation13 + $0x40] sm:$0xff] }
  0x91   :  { %659 = vmatpush.msrb.mxu2 %v619_v4 }
  0x93   :  { %660 = vmatpush.msrb.mxu2 %v618_v5 }
  0x95   :  { %661 = vmatpush.msrb.mxu2 %v617_v6 }
  0x97   :  { %662 = vmatpush.msrb.mxu2 %v616_v7  ;;  %v806_v7 = vld [vmem:[#allocation13 + $0x38] sm:$0xff] }
  0x99   :  { %663 = vmatpush.msrb.mxu2 %v615_v8  ;;  %v805_v8 = vld [vmem:[#allocation13 + $0x30] sm:$0xff] }
  0x9b   :  { %664 = vmatpush.msrb.mxu2 %v614_v9 }
  0x9d   :  { %665 = vmatpush.msrb.mxu2 %v613_v10 }
  0x9f   :  { %666 = vmatpush.msrb.mxu2 %v612_v11 }
  0xa1   :  { %667 = vmatpush.msrb.mxu2 %v611_v12  ;;  %v804_v12 = vld [vmem:[#allocation13 + $0x28] sm:$0xff] }
  0xa3   :  { %668 = vmatpush.msrb.mxu2 %v610_v13 }
  0xa5   :  { %669 = vmatpush.msrb.mxu2 %v609_v14 }
  0xa7   :  { %670 = vmatpush.msrb.mxu2 %v608_v16  ;;  %v803_v16 = vld [vmem:[#allocation13 + $0x20] sm:$0xff] }
  0xa9   :  { %671 = vmatpush.msrb.mxu2 %v607_v18 }
  0xcf   :  { %v354_v32 = vpop.f32.mrf.mxu0 }
  0xd0   :  { %v383_v34 = vpop.f32.mrf.mxu1  ;;  %v355_v35 = vadd.f32 %v1309_v24, %v354_v32 }
  0xd2   :  { %v384_v38 = vadd.f32 %v383_v34, %v355_v35  ;;  %v595_v34 = vld [vmem:[#allocation10 + $0x20] sm:$0xff] }
  0xd3   :  { %v1310_v35 = vld [vmem:[%s1962_s4] ss:$0 sm:$0xff] }
  0xd4   :  { %v395_v40 = vmax.f32 %v384_v38, 0.0 }
  0xd6   :  { %492 = vmatmul.f32.vlgmr.msra.gmra.mxu3 %v395_v40  ;;  %v399_v61 = vrot.slane %v395_v40, 7 }
  0xd7   :  { %v357_v42 = vpop.f32.mrf.mxu0 }
  0xd8   :  { %v386_v44 = vpop.f32.mrf.mxu1  ;;  %v358_v45 = vadd.f32 %v1309_v24, %v357_v42 }
  0xda   :  { %v387_v47 = vadd.f32 %v386_v44, %v358_v45  ;;  %v591_v45 = vld [vmem:[#allocation10] sm:$0xff] }
  0xdc   :  { %v396_v48 = vmax.f32 %v387_v47, 0.0 }
  0xde   :  { %495 = vmatmul.f32.gmra.mxu3 %v396_v48  ;;  %v400_v43 = vrot.slane %v396_v48, 7 }
  0xdf   :  { %v360_v49 = vpop.f32.mrf.mxu0 }
  0xe0   :  { %v389_v50 = vpop.f32.mrf.mxu1  ;;  %v361_v52 = vadd.f32 %v1309_v24, %v360_v49  ;;  %v405_v63 = vsel %vm280_vm0, %v399_v61, %v400_v43  ;;  %v814_v49 = vld [vmem:[#allocation13 + $0x78] sm:$0xff] }
  0xe2   :  { %v390_v53 = vadd.f32 %v389_v50, %v361_v52  ;;  %v813_v50 = vld [vmem:[#allocation13 + $0x70] sm:$0xff] }
  0xe4   :  { %v397_v55 = vmax.f32 %v390_v53, 0.0 }
  0xe6   :  { %498 = vmatmul.f32.gmra.mxu3 %v397_v55  ;;  %v401_v0 = vrot.slane %v397_v55, 7  ;;  %v812_v55 = vld [vmem:[#allocation13 + $0x68] sm:$0xff] }
  0xe7   :  { %v363_v56 = vpop.f32.mrf.mxu0 }
  0xe8   :  { %v392_v57 = vpop.f32.mrf.mxu1  ;;  %v364_v58 = vadd.f32 %v1309_v24, %v363_v56  ;;  %v404_v51 = vsel %vm280_vm0, %v400_v43, %v401_v0  ;;  %v599_v24 = vld [vmem:[#allocation10 + $0x40] sm:$0xff]  ;;  %v809_v43 = vld [vmem:[#allocation13 + $0x50] sm:$0xff] }
  0xe9   :  { %634 = vmatpush.msrb.mxu1 %v599_v24 }
  0xea   :  { %v393_v59 = vadd.f32 %v392_v57, %v364_v58  ;;  %v811_v58 = vld [vmem:[#allocation13 + $0x60] sm:$0xff] }
  0xeb   :  { %635 = vmatpush.msrb.mxu1 %v598_v25  ;;  %v799_v25 = vld [vmem:[#allocation13] sm:$0xff] }
  0xec   :  { %v398_v60 = vmax.f32 %v393_v59, 0.0 }
  0xed   :  { %636 = vmatpush.msrb.mxu1 %v597_v27 }
  0xee   :  { %v402_v62 = vrot.slane %v398_v60, 7  ;;  %501 = vmatmul.f32.gmra.mxu3 %v398_v60 }
  0xef   :  { %637 = vmatpush.msrb.mxu1 %v596_v31 }
  0xf0   :  { %v406_v28 = vsel %vm280_vm0, %v402_v62, %v399_v61  ;;  %v403_v1 = vsel %vm280_vm0, %v401_v0, %v402_v62 }
  0xf1   :  { %1255 = vmatmul.msk.f32.vlgmr.msra.gmra.mxu2 %vm1274_vm1, %v406_v28  ;;  %638 = vmatpush.msrb.mxu1 %v595_v34  ;;  %v810_v28 = vld [vmem:[#allocation13 + $0x58] sm:$0xff] }
  0xf3   :  { %v546_v30 = vpop.f32.mrf.mxu0  ;;  %639 = vmatpush.msrb.mxu1 %v594_v36 }
  0xf4   :  { %v547_v44 = vadd.f32 %v1849_v37, %v546_v30 }
  0xf5   :  { %640 = vmatpush.msrb.mxu1 %v593_v39  ;;  %v731_v39 = vld [vmem:[#allocation11 + $0xf0] sm:$0xff] }
  0xf7   :  { %641 = vmatpush.msrb.mxu1 %v592_v41  ;;  %v729_v41 = vld [vmem:[#allocation11 + $0xe0] sm:$0xff] }
  0xf9   :  { %466 = vmatmul.f32.gmra.mxu2 %v405_v63  ;;  %642 = vmatpush.msrb.mxu1 %v591_v45  ;;  %v726_v45 = vld [vmem:[#allocation11 + $0xc8] sm:$0xff] }
  0xfb   :  { %v549_v46 = vpop.f32.mrf.mxu0  ;;  %819 = vmatpush.msra.mxu1 %v814_v49  ;;  %v722_v49 = vld [vmem:[#allocation11 + $0xa8] sm:$0xff] }
  0xfc   :  { %v550_v60 = vadd.f32 %v1849_v37, %v549_v46  ;;  %v725_v46 = vld [vmem:[#allocation11 + $0xc0] sm:$0xff] }
  0xfd   :  { %820 = vmatpush.msra.mxu1 %v813_v50  ;;  %v721_v50 = vld [vmem:[#allocation11 + $0xa0] sm:$0xff] }
  0xff   :  { %821 = vmatpush.msra.mxu1 %v812_v55  ;;  %v716_v55 = vld [vmem:[#allocation11 + $0x78] sm:$0xff] }
 0x100   :  { %737 = vmatpush.msrb.mxu3 %v716_v55  ;;  %v896_v55 = vld [vmem:[#allocation14 + $0x78] sm:$0xff] }
 0x101   :  { %1257 = vmatmul.msk.f32.gmra.mxu2 %vm1275_vm2, %v404_v51  ;;  %822 = vmatpush.msra.mxu1 %v811_v58  ;;  %v717_v58 = vld [vmem:[#allocation11 + $0x80] sm:$0xff] }
 0x102   :  { %917 = vmatpush.msra.mxu2 %v896_v55 }
 0x103   :  { %v552_v62 = vpop.f32.mrf.mxu0  ;;  %823 = vmatpush.msra.mxu1 %v810_v28  ;;  %v710_v28 = vld [vmem:[#allocation11 + $0x48] sm:$0xff] }
 0x104   :  { %v553_v5 = vadd.f32 %v1849_v37, %v552_v62  ;;  %v711_v62 = vld [vmem:[#allocation11 + $0x50] sm:$0xff] }
 0x105   :  { %824 = vmatpush.msra.mxu1 %v809_v43  ;;  %v709_v43 = vld [vmem:[#allocation11 + $0x40] sm:$0xff] }
 0x109   :  { %472 = vmatmul.f32.gmra.mxu2 %v403_v1  ;;  %v808_v1 = vld [vmem:[#allocation13 + $0x48] sm:$0xff] }
 0x10a   :  { %825 = vmatpush.msra.mxu1 %v808_v1  ;;  %v705_v1 = vld [vmem:[#allocation11 + $0x20] sm:$0xff] }
 0x10b   :  { %v555_v11 = vpop.f32.mrf.mxu0 }
 0x10c   :  { %826 = vmatpush.msra.mxu1 %v807_v29  ;;  %v556_v18 = vadd.f32 %v1849_v37, %v555_v11 }
 0x10e   :  { %827 = vmatpush.msra.mxu1 %v806_v7 }
 0x110   :  { %828 = vmatpush.msra.mxu1 %v805_v8 }
 0x112   :  { %829 = vmatpush.msra.mxu1 %v804_v12 }
 0x114   :  { %830 = vmatpush.msra.mxu1 %v803_v16 }
 0x116   :  { %831 = vmatpush.msra.mxu1 %v802_v20 }
 0x118   :  { %832 = vmatpush.msra.mxu1 %v801_v21 }
 0x11a   :  { %833 = vmatpush.msra.mxu1 %v800_v23 }
 0x11c   :  { %834 = vmatpush.msra.mxu1 %v799_v25 }
 0x159   :  { %v493_v32 = vpop.f32.mrf.mxu3 }
 0x161   :  { %v496_v48 = vpop.f32.mrf.mxu3 }
 0x169   :  { %v499_v0 = vpop.f32.mrf.mxu3 }
 0x171   :  { %v502_v15 = vpop.f32.mrf.mxu3 }
 0x174   :  { %v464_v38 = vpop.f32.mrf.mxu2 }
 0x175   :  { %v465_v40 = vadd.f32 %v1310_v35, %v464_v38  ;;  %v732_v38 = vld [vmem:[#allocation11 + $0xf8] sm:$0xff] }
 0x176   :  { %766 = vmatpush.msra.mxu0 %v732_v38  ;;  %v912_v38 = vld [vmem:[#allocation14 + $0xf8] sm:$0xff] }
 0x177   :  { %v494_v42 = vadd.f32 %v493_v32, %v465_v40  ;;  %v730_v40 = vld [vmem:[#allocation11 + $0xe8] sm:$0xff] }
 0x178   :  { %767 = vmatpush.msra.mxu0 %v731_v39  ;;  %v911_v39 = vld [vmem:[#allocation14 + $0xf0] sm:$0xff] }
 0x179   :  { %v505_v47 = vmax.f32 %v494_v42, 0.0  ;;  %v728_v42 = vld [vmem:[#allocation11 + $0xd8] sm:$0xff] }
 0x17a   :  { %768 = vmatpush.msra.mxu0 %v730_v40  ;;  %v910_v40 = vld [vmem:[#allocation14 + $0xe8] sm:$0xff] }
 0x17b   :  { %v558_v52 = vadd.f32 %v547_v44, %v505_v47  ;;  %v727_v44 = vld [vmem:[#allocation11 + $0xd0] sm:$0xff]  ;;  %v724_v47 = vld [vmem:[#allocation11 + $0xb8] sm:$0xff] }
 0x17c   :  { %v467_v53 = vpop.f32.mrf.mxu2  ;;  %769 = vmatpush.msra.mxu0 %v729_v41  ;;  %v909_v41 = vld [vmem:[#allocation14 + $0xe0] sm:$0xff] }
 0x17d   :  { %v1852_v56 = vmax.f32 %v558_v52, 0.0  ;;  %v468_v57 = vadd.f32 %v1310_v35, %v467_v53  ;;  %v720_v52 = vld [vmem:[#allocation11 + $0x98] sm:$0xff]  ;;  %v719_v53 = vld [vmem:[#allocation11 + $0x90] sm:$0xff] }
 0x17e   :  { %770 = vmatpush.msra.mxu0 %v728_v42  ;;  %v908_v42 = vld [vmem:[#allocation14 + $0xd8] sm:$0xff] }
 0x17f   :  { %v497_v59 = vadd.f32 %v496_v48, %v468_v57  ;;  %672 = vmatmul.f32.vlgmr.msrb.gmra.mxu2 %v1852_v56  ;;  %v566_v27 = vrot.slane %v1852_v56, 6  ;;  %v723_v48 = vld [vmem:[#allocation11 + $0xb0] sm:$0xff] }
 0x180   :  { %771 = vmatpush.msra.mxu0 %v727_v44  ;;  %v715_v57 = vld [vmem:[#allocation11 + $0x70] sm:$0xff] }
 0x181   :  { %v506_v61 = vmax.f32 %v497_v59, 0.0  ;;  %738 = vmatpush.msrb.mxu3 %v715_v57  ;;  %v714_v59 = vld [vmem:[#allocation11 + $0x68] sm:$0xff]  ;;  %v907_v44 = vld [vmem:[#allocation14 + $0xd0] sm:$0xff] }
 0x182   :  { %772 = vmatpush.msra.mxu0 %v726_v45  ;;  %v906_v45 = vld [vmem:[#allocation14 + $0xc8] sm:$0xff]  ;;  %v895_v57 = vld [vmem:[#allocation14 + $0x70] sm:$0xff] }
 0x183   :  { %v559_v63 = vadd.f32 %v550_v60, %v506_v61  ;;  %739 = vmatpush.msrb.mxu3 %v714_v59  ;;  %v713_v60 = vld [vmem:[#allocation11 + $0x60] sm:$0xff]  ;;  %v712_v61 = vld [vmem:[#allocation11 + $0x58] sm:$0xff]  ;;  %918 = vmatpush.msra.mxu2 %v895_v57  ;;  %v894_v59 = vld [vmem:[#allocation14 + $0x68] sm:$0xff] }
 0x184   :  { %v470_v51 = vpop.f32.mrf.mxu2  ;;  %773 = vmatpush.msra.mxu0 %v725_v46  ;;  %v905_v46 = vld [vmem:[#allocation14 + $0xc0] sm:$0xff] }
 0x185   :  { %v563_v2 = vmax.f32 %v559_v63, 0.0  ;;  %v471_v3 = vadd.f32 %v1310_v35, %v470_v51  ;;  %740 = vmatpush.msrb.mxu3 %v713_v60  ;;  %v708_v63 = vld [vmem:[#allocation11 + $0x38] sm:$0xff]  ;;  %v706_v51 = vld [vmem:[#allocation11 + $0x28] sm:$0xff]  ;;  %919 = vmatpush.msra.mxu2 %v894_v59  ;;  %v893_v60 = vld [vmem:[#allocation14 + $0x60] sm:$0xff] }
 0x186   :  { %774 = vmatpush.msra.mxu0 %v724_v47  ;;  %v904_v47 = vld [vmem:[#allocation14 + $0xb8] sm:$0xff]  ;;  %v1021_v59 = vld [vmem:[#allocation16 + $0xf0] sm:$0xff] }
 0x187   :  { %v500_v4 = vadd.f32 %v499_v0, %v471_v3  ;;  %675 = vmatmul.f32.gmra.mxu2 %v563_v2  ;;  %v567_v32 = vrot.slane %v563_v2, 6  ;;  %741 = vmatpush.msrb.mxu3 %v712_v61  ;;  %v707_v0 = vld [vmem:[#allocation11 + $0x30] sm:$0xff]  ;;  %v892_v61 = vld [vmem:[#allocation14 + $0x58] sm:$0xff] }
 0x188   :  { %775 = vmatpush.msra.mxu0 %v723_v48  ;;  %v703_v3 = vld [vmem:[#allocation11 + $0x10] sm:$0xff]  ;;  %920 = vmatpush.msra.mxu2 %v893_v60  ;;  %v1020_v60 = vld [vmem:[#allocation16 + $0xe8] sm:$0xff] }
 0x189   :  { %v507_v6 = vmax.f32 %v500_v4, 0.0  ;;  %v573_v34 = vsel %vm570_vm4, %v566_v27, %v567_v32  ;;  %742 = vmatpush.msrb.mxu3 %v711_v62  ;;  %v702_v4 = vld [vmem:[#allocation11 + $0x8] sm:$0xff]  ;;  %v903_v48 = vld [vmem:[#allocation14 + $0xb0] sm:$0xff] }
 0x18a   :  { %776 = vmatpush.msra.mxu0 %v722_v49  ;;  %v902_v49 = vld [vmem:[#allocation14 + $0xa8] sm:$0xff]  ;;  %921 = vmatpush.msra.mxu2 %v892_v61  ;;  %v891_v62 = vld [vmem:[#allocation14 + $0x50] sm:$0xff]  ;;  %v1019_v61 = vld [vmem:[#allocation16 + $0xe0] sm:$0xff] }
 0x18b   :  { %v560_v9 = vadd.f32 %v553_v5, %v507_v6  ;;  %743 = vmatpush.msrb.mxu3 %v710_v28  ;;  %v1312_v5 = vld [vmem:[%s1966_s8] ss:$0 sm:$0xff]  ;;  %v890_v28 = vld [vmem:[#allocation14 + $0x48] sm:$0xff] }
 0x18c   :  { %v473_v10 = vpop.f32.mrf.mxu2  ;;  %777 = vmatpush.msra.mxu0 %v721_v50  ;;  %v701_v6 = vld [vmem:[#allocation11] sm:$0xff]  ;;  %922 = vmatpush.msra.mxu2 %v891_v62  ;;  %v1018_v62 = vld [vmem:[#allocation16 + $0xd8] sm:$0xff] }
 0x18d   :  { %v564_v13 = vmax.f32 %v560_v9, 0.0  ;;  %v474_v14 = vadd.f32 %v1310_v35, %v473_v10  ;;  %744 = vmatpush.msrb.mxu3 %v709_v43  ;;  %v901_v50 = vld [vmem:[#allocation14 + $0xa0] sm:$0xff] }
 0x18e   :  { %778 = vmatpush.msra.mxu0 %v720_v52  ;;  %v900_v52 = vld [vmem:[#allocation14 + $0x98] sm:$0xff]  ;;  %923 = vmatpush.msra.mxu2 %v890_v28  ;;  %v889_v43 = vld [vmem:[#allocation14 + $0x40] sm:$0xff] }
 0x18f   :  { %v503_v17 = vadd.f32 %v502_v15, %v474_v14  ;;  %678 = vmatmul.f32.gmra.mxu2 %v564_v13  ;;  %v568_v35 = vrot.slane %v564_v13, 6  ;;  %745 = vmatpush.msrb.mxu3 %v708_v63  ;;  %v888_v63 = vld [vmem:[#allocation14 + $0x38] sm:$0xff] }
 0x190   :  { %779 = vmatpush.msra.mxu0 %v719_v53  ;;  %v899_v53 = vld [vmem:[#allocation14 + $0x90] sm:$0xff]  ;;  %924 = vmatpush.msra.mxu2 %v889_v43  ;;  %v1006_v28 = vld [vmem:[#allocation16 + $0x78] sm:$0xff] }
 0x191   :  { %v508_v19 = vmax.f32 %v503_v17, 0.0  ;;  %v572_v36 = vsel %vm570_vm4, %v567_v32, %v568_v35  ;;  %746 = vmatpush.msrb.mxu3 %v707_v0  ;;  %v887_v0 = vld [vmem:[#allocation14 + $0x30] sm:$0xff] }
 0x192   :  { %925 = vmatpush.msra.mxu2 %v888_v63  ;;  %v1017_v43 = vld [vmem:[#allocation16 + $0xd0] sm:$0xff]  ;;  %v1016_v63 = vld [vmem:[#allocation16 + $0xc8] sm:$0xff] }
 0x193   :  { %v561_v22 = vadd.f32 %v556_v18, %v508_v19  ;;  %747 = vmatpush.msrb.mxu3 %v706_v51  ;;  %v886_v51 = vld [vmem:[#allocation14 + $0x28] sm:$0xff] }
 0x194   :  { %926 = vmatpush.msra.mxu2 %v887_v0  ;;  %v1005_v0 = vld [vmem:[#allocation16 + $0x70] sm:$0xff] }
 0x195   :  { %v565_v24 = vmax.f32 %v561_v22, 0.0  ;;  %748 = vmatpush.msrb.mxu3 %v705_v1 }
 0x196   :  { %927 = vmatpush.msra.mxu2 %v886_v51  ;;  %v1015_v51 = vld [vmem:[#allocation16 + $0xc0] sm:$0xff] }
 0x197   :  { %v569_v30 = vrot.slane %v565_v24, 6  ;;  %681 = vmatmul.f32.gmra.mxu2 %v565_v24 }
 0x199   :  { %v574_v31 = vsel %vm570_vm4, %v569_v30, %v566_v27  ;;  %v571_v37 = vsel %vm570_vm4, %v568_v35, %v569_v30 }
 0x19a   :  { %1259 = vmatmul.msk.f32.vlgmr.msrb.gmra.mxu1 %vm1276_vm3, %v574_v31 }
 0x1a2   :  { %646 = vmatmul.f32.gmra.mxu1 %v573_v34 }
 0x1aa   :  { %1261 = vmatmul.msk.f32.gmra.mxu1 %vm1277_vm5, %v572_v36 }
 0x1b2   :  { %652 = vmatmul.f32.gmra.mxu1 %v571_v37 }
 0x1ba   :  { %835 = vmatmul.f32.vlgmr.msra.gmra.mxu1 %v1852_v56  ;;  %v718_v56 = vld [vmem:[#allocation11 + $0x88] sm:$0xff] }
 0x1bb   :  { %780 = vmatpush.msra.mxu0 %v718_v56  ;;  %v898_v56 = vld [vmem:[#allocation14 + $0x88] sm:$0xff] }
 0x1bd   :  { %781 = vmatpush.msra.mxu0 %v717_v58  ;;  %v897_v58 = vld [vmem:[#allocation14 + $0x80] sm:$0xff] }
 0x1bf   :  { %1027 = vmatpush.msrb.mxu0 %v1006_v28 }
 0x1c1   :  { %1028 = vmatpush.msrb.mxu0 %v1005_v0 }
 0x1c2   :  { %838 = vmatmul.f32.gmra.mxu1 %v563_v2  ;;  %v704_v2 = vld [vmem:[#allocation11 + $0x18] sm:$0xff] }
 0x1c3   :  { %749 = vmatpush.msrb.mxu3 %v704_v2 }
 0x1c5   :  { %750 = vmatpush.msrb.mxu3 %v703_v3  ;;  %v885_v3 = vld [vmem:[#allocation14 + $0x20] sm:$0xff] }
 0x1c6   :  { %928 = vmatpush.msra.mxu2 %v885_v3  ;;  %v1003_v3 = vld [vmem:[#allocation16 + $0x60] sm:$0xff] }
 0x1c7   :  { %751 = vmatpush.msrb.mxu3 %v702_v4  ;;  %v884_v4 = vld [vmem:[#allocation14 + $0x18] sm:$0xff] }
 0x1c8   :  { %929 = vmatpush.msra.mxu2 %v884_v4  ;;  %v1002_v4 = vld [vmem:[#allocation16 + $0x58] sm:$0xff] }
 0x1c9   :  { %752 = vmatpush.msrb.mxu3 %v701_v6 }
 0x1ca   :  { %841 = vmatmul.f32.gmra.mxu1 %v564_v13 }
 0x1cb   :  { %946 = vmatpush.msra.mxu3 %v912_v38 }
 0x1cd   :  { %947 = vmatpush.msra.mxu3 %v911_v39 }
 0x1cf   :  { %948 = vmatpush.msra.mxu3 %v910_v40 }
 0x1d1   :  { %949 = vmatpush.msra.mxu3 %v909_v41 }
 0x1d2   :  { %844 = vmatmul.f32.gmra.mxu1 %v565_v24 }
 0x1d3   :  { %950 = vmatpush.msra.mxu3 %v908_v42 }
 0x1d5   :  { %951 = vmatpush.msra.mxu3 %v907_v44 }
 0x1d7   :  { %952 = vmatpush.msra.mxu3 %v906_v45 }
 0x1d9   :  { %953 = vmatpush.msra.mxu3 %v905_v46 }
 0x1db   :  { %954 = vmatpush.msra.mxu3 %v904_v47 }
 0x1dd   :  { %955 = vmatpush.msra.mxu3 %v903_v48 }
 0x1df   :  { %956 = vmatpush.msra.mxu3 %v902_v49 }
 0x1e1   :  { %957 = vmatpush.msra.mxu3 %v901_v50 }
 0x1e3   :  { %958 = vmatpush.msra.mxu3 %v900_v52 }
 0x1e5   :  { %959 = vmatpush.msra.mxu3 %v899_v53 }
 0x1e7   :  { %960 = vmatpush.msra.mxu3 %v898_v56 }
 0x1e9   :  { %961 = vmatpush.msra.mxu3 %v897_v58  ;;  %v1022_v58 = vld [vmem:[#allocation16 + $0xf8] sm:$0xff] }
 0x1ea   :  { %1056 = vmatpush.msrb.mxu1 %v1022_v58 }
 0x1ec   :  { %1057 = vmatpush.msrb.mxu1 %v1021_v59 }
 0x1ee   :  { %1058 = vmatpush.msrb.mxu1 %v1020_v60 }
 0x1f0   :  { %1059 = vmatpush.msrb.mxu1 %v1019_v61 }
 0x1f2   :  { %1060 = vmatpush.msrb.mxu1 %v1018_v62  ;;  %v1112_v62 = vld [vmem:[#allocation17 + $0x78] sm:$0xff] }
 0x1f4   :  { %1061 = vmatpush.msrb.mxu1 %v1017_v43  ;;  %v1110_v43 = vld [vmem:[#allocation17 + $0x68] sm:$0xff] }
 0x1f6   :  { %1062 = vmatpush.msrb.mxu1 %v1016_v63  ;;  %v1108_v63 = vld [vmem:[#allocation17 + $0x58] sm:$0xff] }
 0x1f8   :  { %1063 = vmatpush.msrb.mxu1 %v1015_v51  ;;  %v1106_v51 = vld [vmem:[#allocation17 + $0x48] sm:$0xff] }
 0x202   :  { %v673_v29 = vpop.f32.mrf.mxu2 }
 0x20a   :  { %v676_v11 = vpop.f32.mrf.mxu2 }
 0x212   :  { %v679_v16 = vpop.f32.mrf.mxu2 }
 0x217   :  { %v644_v7 = vpop.f32.mrf.mxu1 }
 0x218   :  { %v645_v8 = vadd.f32 %v1312_v5, %v644_v7  ;;  %v882_v7 = vld [vmem:[#allocation14 + $0x8] sm:$0xff] }
 0x21a   :  { %v674_v9 = vadd.f32 %v673_v29, %v645_v8  ;;  %v682_v23 = vpop.f32.mrf.mxu2  ;;  %v1314_v29 = vld [vmem:[%s1968_s10] ss:$0 sm:$0xff] }
 0x21b   :  { %v1313_v8 = vld [vmem:[%s1970_s12] ss:$0 sm:$0xff] }
 0x21c   :  { %v685_v10 = vmax.f32 %v674_v9, 0.0 }
 0x21e   :  { %782 = vmatmul.f32.vlgmr.msra.gmra.mxu0 %v685_v10  ;;  %v689_v27 = vrot.slane %v685_v10, 6 }
 0x21f   :  { %v647_v12 = vpop.f32.mrf.mxu1 }
 0x220   :  { %v648_v13 = vadd.f32 %v1312_v5, %v647_v12 }
 0x222   :  { %v677_v14 = vadd.f32 %v676_v11, %v648_v13  ;;  %v881_v11 = vld [vmem:[#allocation14] sm:$0xff] }
 0x224   :  { %v686_v15 = vmax.f32 %v677_v14, 0.0 }
 0x226   :  { %785 = vmatmul.f32.gmra.mxu0 %v686_v15  ;;  %v690_v32 = vrot.slane %v686_v15, 6 }
 0x227   :  { %v650_v17 = vpop.f32.mrf.mxu1 }
 0x228   :  { %v651_v18 = vadd.f32 %v1312_v5, %v650_v17  ;;  %v695_v34 = vsel %vm570_vm4, %v689_v27, %v690_v32 }
 0x22a   :  { %v680_v19 = vadd.f32 %v679_v16, %v651_v18 }
 0x22c   :  { %v687_v20 = vmax.f32 %v680_v19, 0.0 }
 0x22e   :  { %788 = vmatmul.f32.gmra.mxu0 %v687_v20  ;;  %v691_v35 = vrot.slane %v687_v20, 6 }
 0x22f   :  { %v653_v21 = vpop.f32.mrf.mxu1 }
 0x230   :  { %v654_v22 = vadd.f32 %v1312_v5, %v653_v21  ;;  %v694_v36 = vsel %vm570_vm4, %v690_v32, %v691_v35  ;;  %v883_v5 = vld [vmem:[#allocation14 + $0x10] sm:$0xff] }
 0x231   :  { %930 = vmatpush.msra.mxu2 %v883_v5  ;;  %v1012_v5 = vld [vmem:[#allocation16 + $0xa8] sm:$0xff] }
 0x232   :  { %v683_v24 = vadd.f32 %v682_v23, %v654_v22 }
 0x233   :  { %931 = vmatpush.msra.mxu2 %v882_v7  ;;  %v1011_v7 = vld [vmem:[#allocation16 + $0xa0] sm:$0xff] }
 0x234   :  { %v688_v25 = vmax.f32 %v683_v24, 0.0 }
 0x235   :  { %932 = vmatpush.msra.mxu2 %v881_v11  ;;  %v1009_v11 = vld [vmem:[#allocation16 + $0x90] sm:$0xff] }
 0x236   :  { %v692_v30 = vrot.slane %v688_v25, 6  ;;  %791 = vmatmul.f32.gmra.mxu0 %v688_v25 }
 0x237   :  { %v836_v1 = vpop.f32.mrf.mxu1  ;;  %1117 = vmatpush.msrb.mxu2 %v1112_v62 }
 0x238   :  { %v696_v31 = vsel %vm570_vm4, %v692_v30, %v689_v27  ;;  %v693_v37 = vsel %vm570_vm4, %v691_v35, %v692_v30  ;;  %v837_v12 = vadd.f32 %v1313_v8, %v836_v1  ;;  %v1004_v1 = vld [vmem:[#allocation16 + $0x68] sm:$0xff] }
 0x239   :  { %1263 = vmatmul.msk.f32.vlgmr.msrb.gmra.mxu3 %vm1276_vm3, %v696_v31  ;;  %1029 = vmatpush.msrb.mxu0 %v1004_v1 }
 0x23a   :  { %1280 = vmatpush.msrb.mxu3 %v1006_v28  ;;  %v1111_v28 = vld [vmem:[#allocation17 + $0x70] sm:$0xff] }
 0x23b   :  { %1030 = vmatpush.msrb.mxu0 %v1003_v3  ;;  %1118 = vmatpush.msrb.mxu2 %v1111_v28 }
 0x23c   :  { %1281 = vmatpush.msrb.mxu3 %v1005_v0  ;;  %v1107_v0 = vld [vmem:[#allocation17 + $0x50] sm:$0xff] }
 0x23d   :  { %1031 = vmatpush.msrb.mxu0 %v1002_v4  ;;  %1119 = vmatpush.msrb.mxu2 %v1110_v43 }
 0x23e   :  { %1282 = vmatpush.msrb.mxu3 %v1004_v1  ;;  %v1104_v1 = vld [vmem:[#allocation17 + $0x38] sm:$0xff] }
 0x23f   :  { %v839_v13 = vpop.f32.mrf.mxu1  ;;  %1120 = vmatpush.msrb.mxu2 %v1109_v54 }
 0x240   :  { %v840_v21 = vadd.f32 %v1313_v8, %v839_v13  ;;  %1283 = vmatpush.msrb.mxu3 %v1003_v3  ;;  %v1008_v13 = vld [vmem:[#allocation16 + $0x88] sm:$0xff]  ;;  %v1101_v3 = vld [vmem:[#allocation17 + $0x20] sm:$0xff] }
 0x241   :  { %756 = vmatmul.f32.gmra.mxu3 %v695_v34  ;;  %1121 = vmatpush.msrb.mxu2 %v1108_v63 }
 0x242   :  { %1284 = vmatpush.msrb.mxu3 %v1002_v4  ;;  %v1099_v4 = vld [vmem:[#allocation17 + $0x10] sm:$0xff] }
 0x243   :  { %1122 = vmatpush.msrb.mxu2 %v1107_v0 }
 0x245   :  { %1123 = vmatpush.msrb.mxu2 %v1106_v51 }
 0x247   :  { %v842_v23 = vpop.f32.mrf.mxu1  ;;  %1124 = vmatpush.msrb.mxu2 %v1105_v26 }
 0x248   :  { %v843_v34 = vadd.f32 %v1313_v8, %v842_v23 }
 0x249   :  { %1265 = vmatmul.msk.f32.gmra.mxu3 %vm1277_vm5, %v694_v36  ;;  %1125 = vmatpush.msrb.mxu2 %v1104_v1 }
 0x24b   :  { %1126 = vmatpush.msrb.mxu2 %v1103_v33 }
 0x24f   :  { %v845_v40 = vpop.f32.mrf.mxu1 }
 0x250   :  { %v846_v44 = vadd.f32 %v1313_v8, %v845_v40  ;;  %v1000_v8 = vld [vmem:[#allocation16 + $0x48] sm:$0xff] }
 0x251   :  { %762 = vmatmul.f32.gmra.mxu3 %v693_v37 }
 0x29b   :  { %v783_v2 = vpop.f32.mrf.mxu0 }
 0x2a3   :  { %v786_v15 = vpop.f32.mrf.mxu0 }
 0x2ab   :  { %v789_v25 = vpop.f32.mrf.mxu0 }
 0x2b3   :  { %v792_v41 = vpop.f32.mrf.mxu0 }
 0x2bc   :  { %v754_v6 = vpop.f32.mrf.mxu3 }
 0x2bd   :  { %v755_v9 = vadd.f32 %v1314_v29, %v754_v6  ;;  %v1001_v6 = vld [vmem:[#allocation16 + $0x50] sm:$0xff] }
 0x2be   :  { %1285 = vmatpush.msrb.mxu3 %v1001_v6  ;;  %1032 = vmatpush.msrb.mxu0 %v1001_v6  ;;  %v1097_v6 = vld [vmem:[#allocation17] sm:$0xff] }
 0x2bf   :  { %v784_v10 = vadd.f32 %v783_v2, %v755_v9  ;;  %v1014_v2 = vld [vmem:[#allocation16 + $0xb8] sm:$0xff] }
 0x2c0   :  { %1064 = vmatpush.msrb.mxu1 %v1014_v2  ;;  %1286 = vmatpush.msrb.mxu3 %v1000_v8  ;;  %v1010_v9 = vld [vmem:[#allocation16 + $0x98] sm:$0xff]  ;;  %v1102_v2 = vld [vmem:[#allocation17 + $0x28] sm:$0xff] }
 0x2c1   :  { %v795_v14 = vmax.f32 %v784_v10, 0.0  ;;  %1033 = vmatpush.msrb.mxu0 %v1000_v8  ;;  %v999_v10 = vld [vmem:[#allocation16 + $0x40] sm:$0xff]  ;;  %1127 = vmatpush.msrb.mxu2 %v1102_v2 }
 0x2c2   :  { %1287 = vmatpush.msrb.mxu3 %v999_v10 }
 0x2c3   :  { %v848_v16 = vadd.f32 %v837_v12, %v795_v14  ;;  %1034 = vmatpush.msrb.mxu0 %v999_v10  ;;  %v998_v12 = vld [vmem:[#allocation16 + $0x38] sm:$0xff]  ;;  %v997_v14 = vld [vmem:[#allocation16 + $0x30] sm:$0xff]  ;;  %1128 = vmatpush.msrb.mxu2 %v1101_v3 }
 0x2c4   :  { %v757_v17 = vpop.f32.mrf.mxu3  ;;  %1288 = vmatpush.msrb.mxu3 %v998_v12 }
 0x2c5   :  { %v1896_v18 = vmax.f32 %v848_v16, 0.0  ;;  %v758_v19 = vadd.f32 %v1314_v29, %v757_v17  ;;  %1035 = vmatpush.msrb.mxu0 %v998_v12  ;;  %v996_v16 = vld [vmem:[#allocation16 + $0x28] sm:$0xff]  ;;  %v995_v17 = vld [vmem:[#allocation16 + $0x20] sm:$0xff] }
 0x2c6   :  { %1289 = vmatpush.msrb.mxu3 %v997_v14 }
 0x2c7   :  { %v787_v20 = vadd.f32 %v786_v15, %v758_v19  ;;  %962 = vmatmul.f32.vlgmr.msra.gmra.mxu3 %v1896_v18  ;;  %v856_v48 = vrot.slane %v1896_v18, 4  ;;  %v1007_v15 = vld [vmem:[#allocation16 + $0x80] sm:$0xff]  ;;  %1036 = vmatpush.msrb.mxu0 %v997_v14  ;;  %v994_v19 = vld [vmem:[#allocation16 + $0x18] sm:$0xff] }
 0x2c8   :  { %1290 = vmatpush.msrb.mxu3 %v996_v16 }
 0x2c9   :  { %v796_v22 = vmax.f32 %v787_v20, 0.0  ;;  %1037 = vmatpush.msrb.mxu0 %v996_v16  ;;  %v993_v20 = vld [vmem:[#allocation16 + $0x10] sm:$0xff] }
 0x2ca   :  { %1291 = vmatpush.msrb.mxu3 %v995_v17 }
 0x2cb   :  { %v849_v24 = vadd.f32 %v840_v21, %v796_v22  ;;  %1038 = vmatpush.msrb.mxu0 %v995_v17  ;;  %v992_v21 = vld [vmem:[#allocation16 + $0x8] sm:$0xff]  ;;  %v991_v22 = vld [vmem:[#allocation16] sm:$0xff] }
 0x2cc   :  { %v760_v27 = vpop.f32.mrf.mxu3  ;;  %1292 = vmatpush.msrb.mxu3 %v994_v19 }
 0x2cd   :  { %v761_v30 = vadd.f32 %v1314_v29, %v760_v27  ;;  %v1899_v31 = vmax.f32 %v849_v24, 0.0  ;;  %1039 = vmatpush.msrb.mxu0 %v994_v19  ;;  %v1315_v24 = vld [vmem:[%s1972_s14] ss:$0 sm:$0xff] }
 0x2ce   :  { %1293 = vmatpush.msrb.mxu3 %v993_v20 }
 0x2cf   :  { %v790_v32 = vadd.f32 %v789_v25, %v761_v30  ;;  %965 = vmatmul.f32.gmra.mxu3 %v1899_v31  ;;  %v857_v52 = vrot.slane %v1899_v31, 4  ;;  %1040 = vmatpush.msrb.mxu0 %v993_v20 }
 0x2d0   :  { %1294 = vmatpush.msrb.mxu3 %v992_v21 }
 0x2d1   :  { %v797_v35 = vmax.f32 %v790_v32, 0.0  ;;  %v863_v53 = vsel %vm860_vm7, %v856_v48, %v857_v52  ;;  %1041 = vmatpush.msrb.mxu0 %v992_v21 }
 0x2d2   :  { %1295 = vmatpush.msrb.mxu3 %v991_v22 }
 0x2d3   :  { %v850_v36 = vadd.f32 %v843_v34, %v797_v35  ;;  %1042 = vmatpush.msrb.mxu0 %v991_v22 }
 0x2d4   :  { %v763_v37 = vpop.f32.mrf.mxu3 }
 0x2d5   :  { %v764_v38 = vadd.f32 %v1314_v29, %v763_v37  ;;  %v1902_v39 = vmax.f32 %v850_v36, 0.0  ;;  %v1013_v29 = vld [vmem:[#allocation16 + $0xb0] sm:$0xff] }
 0x2d6   :  { %1065 = vmatpush.msrb.mxu1 %v1013_v29  ;;  %v1100_v29 = vld [vmem:[#allocation17 + $0x18] sm:$0xff] }
 0x2d7   :  { %v793_v42 = vadd.f32 %v792_v41, %v764_v38  ;;  %968 = vmatmul.f32.gmra.mxu3 %v1902_v39  ;;  %v858_v55 = vrot.slane %v1902_v39, 4  ;;  %1129 = vmatpush.msrb.mxu2 %v1100_v29 }
 0x2d8   :  { %1066 = vmatpush.msrb.mxu1 %v1012_v5  ;;  %v1098_v5 = vld [vmem:[#allocation17 + $0x8] sm:$0xff] }
 0x2d9   :  { %v798_v45 = vmax.f32 %v793_v42, 0.0  ;;  %v862_v56 = vsel %vm860_vm7, %v857_v52, %v858_v55  ;;  %1130 = vmatpush.msrb.mxu2 %v1099_v4 }
 0x2da   :  { %1067 = vmatpush.msrb.mxu1 %v1011_v7 }
 0x2db   :  { %v851_v46 = vadd.f32 %v846_v44, %v798_v45  ;;  %1131 = vmatpush.msrb.mxu2 %v1098_v5 }
 0x2dc   :  { %1068 = vmatpush.msrb.mxu1 %v1010_v9  ;;  %v1316_v9 = vld [vmem:[%s1974_s16] ss:$0 sm:$0xff] }
 0x2dd   :  { %v1905_v47 = vmax.f32 %v851_v46, 0.0  ;;  %1132 = vmatpush.msrb.mxu2 %v1097_v6 }
 0x2de   :  { %1069 = vmatpush.msrb.mxu1 %v1009_v11 }
 0x2df   :  { %v859_v49 = vrot.slane %v1905_v47, 4  ;;  %971 = vmatmul.f32.gmra.mxu3 %v1905_v47 }
 0x2e0   :  { %1070 = vmatpush.msrb.mxu1 %v1008_v13 }
 0x2e1   :  { %v864_v50 = vsel %vm860_vm7, %v859_v49, %v856_v48  ;;  %v861_v57 = vsel %vm860_vm7, %v858_v55, %v859_v49 }
 0x2e2   :  { %1267 = vmatmul.msk.f32.vlgmr.msra.gmra.mxu2 %vm1278_vm6, %v864_v50  ;;  %1071 = vmatpush.msrb.mxu1 %v1007_v15 }
 0x2ea   :  { %936 = vmatmul.f32.gmra.mxu2 %v863_v53 }
 0x2f2   :  { %1269 = vmatmul.msk.f32.gmra.mxu2 %vm1279_vm8, %v862_v56 }
 0x2fa   :  { %942 = vmatmul.f32.gmra.mxu2 %v861_v57 }
 0x34a   :  { %v963_v23 = vpop.f32.mrf.mxu3 }
 0x352   :  { %v966_v34 = vpop.f32.mrf.mxu3 }
 0x35a   :  { %v969_v42 = vpop.f32.mrf.mxu3 }
 0x362   :  { %v972_v56 = vpop.f32.mrf.mxu3 }
 0x365   :  { %v934_v25 = vpop.f32.mrf.mxu2 }
 0x366   :  { %v935_v27 = vadd.f32 %v1315_v24, %v934_v25 }
 0x368   :  { %v964_v30 = vadd.f32 %v963_v23, %v935_v27 }
 0x36a   :  { %v975_v32 = vmax.f32 %v964_v30, 0.0 }
 0x36c   :  { %1072 = vmatmul.f32.vlgmr.msrb.gmra.mxu1 %v975_v32  ;;  %v979_v40 = vrot.slane %v975_v32, 4 }
 0x36d   :  { %v937_v35 = vpop.f32.mrf.mxu2 }
 0x36e   :  { %v938_v36 = vadd.f32 %v1315_v24, %v937_v35 }
 0x370   :  { %v967_v37 = vadd.f32 %v966_v34, %v938_v36 }
 0x372   :  { %v976_v38 = vmax.f32 %v967_v37, 0.0 }
 0x374   :  { %v980_v41 = vrot.slane %v976_v38, 4  ;;  %1075 = vmatmul.f32.gmra.mxu1 %v976_v38 }
 0x375   :  { %v940_v44 = vpop.f32.mrf.mxu2 }
 0x376   :  { %v941_v45 = vadd.f32 %v1315_v24, %v940_v44  ;;  %v985_v46 = vsel %vm860_vm7, %v979_v40, %v980_v41 }
 0x377   :  { %1046 = vmatmul.f32.vlgmr.msrb.gmra.mxu3 %v985_v46 }
 0x378   :  { %v970_v48 = vadd.f32 %v969_v42, %v941_v45 }
 0x37a   :  { %v977_v49 = vmax.f32 %v970_v48, 0.0 }
 0x37c   :  { %v981_v50 = vrot.slane %v977_v49, 4  ;;  %1078 = vmatmul.f32.gmra.mxu1 %v977_v49 }
 0x37d   :  { %v943_v52 = vpop.f32.mrf.mxu2 }
 0x37e   :  { %v944_v53 = vadd.f32 %v1315_v24, %v943_v52  ;;  %v984_v55 = vsel %vm860_vm7, %v980_v41, %v981_v50 }
 0x37f   :  { %1273 = vmatmul.msk.f32.gmra.mxu3 %vm1279_vm8, %v984_v55 }
 0x380   :  { %v973_v57 = vadd.f32 %v972_v56, %v944_v53 }
 0x382   :  { %v978_v58 = vmax.f32 %v973_v57, 0.0 }
 0x384   :  { %v982_v59 = vrot.slane %v978_v58, 4  ;;  %1081 = vmatmul.f32.gmra.mxu1 %v978_v58 }
 0x386   :  { %v986_v60 = vsel %vm860_vm7, %v982_v59, %v979_v40  ;;  %v983_v61 = vsel %vm860_vm7, %v981_v50, %v982_v59 }
 0x387   :  { %1271 = vmatmul.msk.f32.vlgmr.msrb.gmra.mxu0 %vm1278_vm6, %v986_v60  ;;  %1052 = vmatmul.f32.gmra.mxu3 %v983_v61 }
 0x3e9   :  { %v1073_v7 = vpop.f32.mrf.mxu1 }
 0x3f1   :  { %v1076_v10 = vpop.f32.mrf.mxu1 }
 0x3f9   :  { %v1079_v23 = vpop.f32.mrf.mxu1 }
 0x3fa   :  { %v1047_v8 = vpop.f32.mrf.mxu3 }
 0x3fb   :  { %v1048_v12 = vadd.f32 %v1316_v9, %v1047_v8 }
 0x3fd   :  { %v1077_v16 = vadd.f32 %v1076_v10, %v1048_v12 }
 0x3ff   :  { %v1086_v20 = vmax.f32 %v1077_v16, 0.0 }
 0x401   :  { %v1090_v25 = vadd.f32 %v1086_v20, %v1899_v31  ;;  %v1082_v35 = vpop.f32.mrf.mxu1  ;;  %v1317_v31 = vld [vmem:[%s1976_s18] ss:$0 sm:$0xff]  ;;  %s1624_s18 = smov [#allocation19]  }
 0x402   :  { %v1050_v15 = vpop.f32.mrf.mxu3  ;;  %s1230_s5 = sshll.u32 %s1624_s18, 4  ;;  %s1231_s5 = int_to_ptr.vmem [resolvable:$true] %s1230_s5 }
 0x403   :  { %v1051_v21 = vadd.f32 %v1316_v9, %v1050_v15  ;;  %v1094_v34 = vmax.f32 %v1090_v25, 0.0 }
 0x404   :  { %v1044_v11 = vpop.f32.mrf.mxu0 }
 0x405   :  { %v1045_v13 = vadd.f32 %v1316_v9, %v1044_v11  ;;  %v1080_v24 = vadd.f32 %v1079_v23, %v1051_v21 }
 0x407   :  { %v1074_v14 = vadd.f32 %v1073_v7, %v1045_v13  ;;  %v1087_v30 = vmax.f32 %v1080_v24, 0.0 }
 0x409   :  { %v1085_v17 = vmax.f32 %v1074_v14, 0.0  ;;  %v1091_v37 = vadd.f32 %v1087_v30, %v1902_v39 }
 0x40a   :  { %v1053_v27 = vpop.f32.mrf.mxu3 }
 0x40b   :  { %v1089_v19 = vadd.f32 %v1085_v17, %v1896_v18  ;;  %v1054_v32 = vadd.f32 %v1316_v9, %v1053_v27  ;;  %v1095_v40 = vmax.f32 %v1091_v37, 0.0 }
 0x40d   :  { %v1093_v22 = vmax.f32 %v1089_v19, 0.0  ;;  %v1083_v36 = vadd.f32 %v1082_v35, %v1054_v32 }
 0x40f   :  { %1133 = vmatmul.f32.vlgmr.msrb.gmra.mxu2 %v1093_v22  ;;  %v1088_v38 = vmax.f32 %v1083_v36, 0.0 }
 0x411   :  { %v1092_v18 = vadd.f32 %v1088_v38, %v1905_v47 }
 0x413   :  { %v1096_v41 = vmax.f32 %v1092_v18, 0.0 }
 0x417   :  { %1136 = vmatmul.f32.gmra.mxu2 %v1094_v34 }
 0x41f   :  { %1139 = vmatmul.f32.gmra.mxu2 %v1095_v40 }
 0x427   :  { %1142 = vmatmul.f32.gmra.mxu2 %v1096_v41 }
 0x492   :  { %v1134_v42 = vpop.f32.mrf.mxu2 }
 0x493   :  { %v1135_v44 = vadd.f32 %v1317_v31, %v1134_v42 }
 0x495   :  { %v1146_v45 = vsub.f32 0.0, %v1135_v44 }
 0x497   :  { %v1150_v46 = vmul.f32 1.442695, %v1146_v45 }
 0x499   :  { %1318 = vpow2.f32 %v1150_v46 }
 0x49a   :  { %v1137_v48 = vpop.f32.mrf.mxu2 }
 0x49b   :  { %v1138_v49 = vadd.f32 %v1317_v31, %v1137_v48 }
 0x49d   :  { %v1147_v50 = vsub.f32 0.0, %v1138_v49 }
 0x49f   :  { %v1319_v39 = vpop.eup %1318  ;;  %v1152_v52 = vmul.f32 1.442695, %v1147_v50 }
 0x4a0   :  { %v1158_v53 = vadd.f32 1.0, %v1319_v39 }
 0x4a1   :  { %1320 = vpow2.f32 %v1152_v52 }
 0x4a2   :  { %1322 = vrcp.f32 %v1158_v53  ;;  %v1140_v47 = vpop.f32.mrf.mxu2  ;;  %v1173_v54 = vand.u32 2147483648, %v1158_v53  ;;  %v1171_v51 = vand.u32 2147483647, %v1158_v53  ;;  %vm1167_vm10 = vweird.f32 %v1158_v53 }
 0x4a3   :  { %v1141_v55 = vadd.f32 %v1317_v31, %v1140_v47 }
 0x4a4   :  { %v1174_v3 = vor.u32 1.1754944e-38, %v1173_v54  ;;  %vm1172_vm12 = vcmp.eq.f32.partialorder %v1171_v51, 8.507059e+37 }
 0x4a5   :  { %v1148_v56 = vsub.f32 0.0, %v1141_v55 }
 0x4a7   :  { %v1321_v57 = vpop.eup %1320  ;;  %v1154_v58 = vmul.f32 1.442695, %v1148_v56 }
 0x4a8   :  { %v1323_v59 = vpop.eup %1322  ;;  %v1159_v60 = vadd.f32 1.0, %v1321_v57 }
 0x4a9   :  { %v1163_v61 = vmul.f32 %v1323_v59, %v1158_v53  ;;  %1324 = vpow2.f32 %v1154_v58  ;;  %vm1168_vm9 = vweird.f32 %v1323_v59 }
 0x4aa   :  { %1326 = vrcp.f32 %v1159_v60  ;;  %v1143_v62 = vpop.f32.mrf.mxu2  ;;  %vm1169_vm11 = vmor %vm1167_vm10, %vm1168_vm9  ;;  %v1188_v8 = vand.u32 2147483648, %v1159_v60  ;;  %v1186_v10 = vand.u32 2147483647, %v1159_v60  ;;  %vm1182_vm14 = vweird.f32 %v1159_v60 }
 0x4ab   :  { %v1164_v28 = vsub.f32 1.0, %v1163_v61  ;;  %v1144_v43 = vadd.f32 %v1317_v31, %v1143_v62 }
 0x4ac   :  { %v1189_v14 = vor.u32 1.1754944e-38, %v1188_v8  ;;  %vm1187_vm0 = vcmp.eq.f32.partialorder %v1186_v10, 8.507059e+37 }
 0x4ad   :  { %v1165_v63 = vmul.f32 %v1323_v59, %v1164_v28  ;;  %v1149_v0 = vsub.f32 0.0, %v1144_v43 }
 0x4af   :  { %v1325_v26 = vpop.eup %1324  ;;  %v1156_v1 = vmul.f32 1.442695, %v1149_v0  ;;  %v1166_v33 = vadd.f32 %v1323_v59, %v1165_v63 }
 0x4b0   :  { %v1327_v2 = vpop.eup %1326  ;;  %v1160_v29 = vadd.f32 1.0, %v1325_v26 }
 0x4b1   :  { %v1178_v4 = vmul.f32 %v1327_v2, %v1159_v60  ;;  %1328 = vpow2.f32 %v1156_v1  ;;  %v1170_v5 = vsel %vm1169_vm11, %v1323_v59, %v1166_v33  ;;  %vm1183_vm13 = vweird.f32 %v1327_v2 }
 0x4b2   :  { %1330 = vrcp.f32 %v1160_v29  ;;  %v1175_v6 = vsel %vm1172_vm12, %v1174_v3, %v1170_v5  ;;  %vm1184_vm15 = vmor %vm1182_vm14, %vm1183_vm13  ;;  %v1203_v21 = vand.u32 2147483648, %v1160_v29  ;;  %v1201_v23 = vand.u32 2147483647, %v1160_v29 }
 0x4b3   :  { %v1179_v7 = vsub.f32 1.0, %v1178_v4  ;;  %1222 = vst [vmem:[#allocation19] sm:$0xff] %v1175_v6  ;;  %vm1197_vm2 = vweird.f32 %v1160_v29 }
 0x4b4   :  { %v1204_v27 = vor.u32 1.1754944e-38, %v1203_v21  ;;  %vm1202_vm4 = vcmp.eq.f32.partialorder %v1201_v23, 8.507059e+37 }
 0x4b5   :  { %v1180_v9 = vmul.f32 %v1327_v2, %v1179_v7 }
 0x4b7   :  { %v1329_v11 = vpop.eup %1328  ;;  %v1181_v12 = vadd.f32 %v1327_v2, %v1180_v9 }
 0x4b8   :  { %v1331_v13 = vpop.eup %1330  ;;  %v1161_v15 = vadd.f32 1.0, %v1329_v11 }
 0x4b9   :  { %v1193_v16 = vmul.f32 %v1331_v13, %v1160_v29  ;;  %v1185_v17 = vsel %vm1184_vm15, %v1327_v2, %v1181_v12  ;;  %vm1198_vm1 = vweird.f32 %v1331_v13 }
 0x4ba   :  { %1332 = vrcp.f32 %v1161_v15  ;;  %v1190_v19 = vsel %vm1187_vm0, %v1189_v14, %v1185_v17  ;;  %vm1199_vm3 = vmor %vm1197_vm2, %vm1198_vm1  ;;  %v1218_v36 = vand.u32 2147483648, %v1161_v15  ;;  %v1216_v38 = vand.u32 2147483647, %v1161_v15 }
 0x4bb   :  { %v1194_v20 = vsub.f32 1.0, %v1193_v16  ;;  %1223 = vst [vmem:[#allocation19 + $0x8] sm:$0xff] %v1190_v19  ;;  %vm1212_vm6 = vweird.f32 %v1161_v15 }
 0x4bc   :  { %v1219_v18 = vor.u32 1.1754944e-38, %v1218_v36  ;;  %vm1217_vm8 = vcmp.eq.f32.partialorder %v1216_v38, 8.507059e+37 }
 0x4bd   :  { %v1195_v22 = vmul.f32 %v1331_v13, %v1194_v20 }
 0x4bf   :  { %v1196_v24 = vadd.f32 %v1331_v13, %v1195_v22 }
 0x4c0   :  { %v1333_v25 = vpop.eup %1332 }
 0x4c1   :  { %v1208_v30 = vmul.f32 %v1333_v25, %v1161_v15  ;;  %v1200_v32 = vsel %vm1199_vm3, %v1331_v13, %v1196_v24  ;;  %vm1213_vm5 = vweird.f32 %v1333_v25 }
 0x4c2   :  { %v1205_v34 = vsel %vm1202_vm4, %v1204_v27, %v1200_v32  ;;  %vm1214_vm7 = vmor %vm1212_vm6, %vm1213_vm5 }
 0x4c3   :  { %v1209_v35 = vsub.f32 1.0, %v1208_v30  ;;  %1224 = vst [vmem:[#allocation19 + $0x10] sm:$0xff] %v1205_v34 }
 0x4c5   :  { %v1210_v37 = vmul.f32 %v1333_v25, %v1209_v35 }
 0x4c7   :  { %v1211_v40 = vadd.f32 %v1333_v25, %v1210_v37 }
 0x4c9   :  { %v1215_v41 = vsel %vm1214_vm7, %v1333_v25, %v1211_v40 }
 0x4ca   :  { %v1220_v31 = vsel %vm1217_vm8, %v1219_v18, %v1215_v41 }
 0x4cb   :  { %1225 = vst [vmem:[#allocation19 + $0x18] sm:$0xff] %v1220_v31 }
 0x4cc   :  { %1238 = dma.vmem_to_hbm [thread:$0]  %s1231_s5, 512, %s1233_s30, [#allocation4], %s1613_s25, %s1613_s25, %s1614_s3  }
 0x4cd   :  { %1610 = dma.done.wait [#allocation4], 512  }
 0x4ce   :  { %1611 = vsyncadd [#allocation4], 4294966784 }
 0x4cf   :  { %1243 = vsyncpa [#allocation3], 1 }
 0x4d0   :  { %1244 = vsyncpa [#allocation6], 1 }
 0x4d1   :  { %1245 = vsyncpa [#allocation9], 1 }
 0x4d2   :  { %1246 = vsyncpa [#allocation12], 1 }
 0x4d3   :  { %1247 = vsyncpa [#allocation15], 1 }
 0x4d4   :  { %1248 = vsyncpa [#allocation18], 1 }
 0x4d5   :  { %1249 = vsyncpa [#allocation4], 1 }

</bundles_post_ra>
